<compile_context>
chip_gen: v5e
topology: v5e:2x2
jax: 0.10.0
libtpu: 0.0.40
codegen_flags: <defaults>
</compile_context>

<pallas_src>
import functools
import math

import jax
import jax.numpy as jnp
import numpy as np
from jax.experimental import pallas as pl
from jax.experimental.pallas import tpu as pltpu


def _full_spec(shape):
    """Whole-array BlockSpec (block index constant across the batch grid)."""
    zeros = (0,) * len(shape)
    return pl.BlockSpec(tuple(shape), lambda b, _z=zeros: _z)


# -----------------------------------------------------------------------------
# Wrapper-side parameter preprocessing (plain JAX, outside the kernel).
# -----------------------------------------------------------------------------
def _banded_conv_mats(w_l, W):
    """(ks, ks, cin, cout) -> (ks, W*cin, W*cout) banded matrices.

    M[ky][u*cin+ci, w*cout+co] = w_l[ky, u-w+p, ci, co] if 0 <= u-w+p < ks else 0,
    so  sum_ky  x_hpad[ky:ky+H, :] @ M[ky]  equals the 'same'-padded conv with the
    W zero-padding folded into the band structure (zeros multiply exactly).
    """
    ks_, _, cin, cout = w_l.shape
    p = (ks_ - 1) // 2
    u = jnp.arange(W)[:, None]
    wi = jnp.arange(W)[None, :]
    kx = u - wi + p                                           # (W, W)
    valid = ((kx >= 0) & (kx < ks_)).astype(w_l.dtype)
    kxc = jnp.clip(kx, 0, ks_ - 1)
    mats = []
    for ky in range(ks_):
        blk = w_l[ky][kxc] * valid[:, :, None, None]          # (W, W, cin, cout)
        mats.append(jnp.transpose(blk, (0, 2, 1, 3)).reshape(W * cin, W * cout))
    return jnp.stack(mats, axis=0).astype(jnp.float32)


def _wpool_select_mats(W, cout, pool):
    """(pool, W*cout, (W//pool)*cout) 0/1 matrices selecting lane w = wp*pool + k."""
    Wp = W // pool
    eye_c = jnp.eye(cout, dtype=jnp.float32)
    mats = []
    for k in range(pool):
        sel = jnp.zeros((W, Wp), jnp.float32).at[
            jnp.arange(Wp) * pool + k, jnp.arange(Wp)].set(1.0)
        mats.append(jnp.kron(sel, eye_c))
    return jnp.stack(mats, axis=0)


def _hpool_select_mats(H, pool):
    """(pool, H//pool, H) 0/1 matrices selecting row h = hp*pool + k."""
    Ho = H // pool
    mats = []
    for k in range(pool):
        sel = jnp.zeros((Ho, H), jnp.float32).at[
            jnp.arange(Ho), jnp.arange(Ho) * pool + k].set(1.0)
        mats.append(sel)
    return jnp.stack(mats, axis=0)


# -----------------------------------------------------------------------------
# Kernel: one image per grid step; everything stays in registers.
# -----------------------------------------------------------------------------
def _encoder_kernel(*refs, layer_dims, ks, pad):
    n_layers = len(layer_dims)
    x_ref = refs[0]
    layer_refs = refs[1:1 + 5 * n_layers]
    avg_ref, fw1_ref, fb1_ref, fw2_ref, fb2_ref, o_ref = refs[1 + 5 * n_layers:]

    act = x_ref[0]                                            # (H0, W0*cin0), cin0 == 1
    for l in range(n_layers):
        H, W, cin, cout, pool = layer_dims[l]
        mb_ref, sc_ref, sh_ref, selw_ref, selh_ref = layer_refs[5 * l:5 * l + 5]
        Ho = H // pool

        # ---- conv: ks row-shifted banded matmuls (W zero-pad folded into mats)
        if pad > 0:
            zrow = jnp.zeros((pad, W * cin), jnp.float32)
            xcat = jnp.concatenate([zrow, act, zrow], axis=0)  # (H + 2*pad, W*cin)
        else:
            xcat = act
        acc = jnp.zeros((H, W * cout), jnp.float32)
        for ky in range(ks):
            acc = acc + jnp.dot(xcat[ky:ky + H, :], mb_ref[ky],
                                preferred_element_type=jnp.float32)

        # ---- folded eval-mode BatchNorm + ReLU (scale/shift pre-tiled over W lanes)
        y = jnp.maximum(acc * sc_ref[...] + sh_ref[...], 0.0)  # (H, W*cout)

        # ---- MaxPool(pool, pool): max over exact 0/1 selection matmuls
        wp_m = jnp.dot(y, selw_ref[0], preferred_element_type=jnp.float32)
        for k in range(1, pool):
            wp_m = jnp.maximum(
                wp_m, jnp.dot(y, selw_ref[k], preferred_element_type=jnp.float32))
        if Ho == 1:
            act = jnp.max(wp_m, axis=0, keepdims=True)          # (1, Wp*cout)
        else:
            hp_m = jnp.dot(selh_ref[0], wp_m, preferred_element_type=jnp.float32)
            for k in range(1, pool):
                hp_m = jnp.maximum(
                    hp_m, jnp.dot(selh_ref[k], wp_m,
                                  preferred_element_type=jnp.float32))
            act = hp_m                                          # (Ho, Wp*cout)

    # ---- AdaptiveAvgPool2d((1,1)) + fcpart (Linear -> ReLU -> Linear)
    pooled = jnp.dot(jnp.mean(act, axis=0, keepdims=True), avg_ref[...],
                     preferred_element_type=jnp.float32)        # (1, C_last)
    h1 = jnp.maximum(
        jnp.dot(pooled, fw1_ref[...], preferred_element_type=jnp.float32)
        + fb1_ref[...], 0.0)
    out = jnp.dot(h1, fw2_ref[...], preferred_element_type=jnp.float32) + fb2_ref[...]
    o_ref[...] = out.reshape(o_ref.shape).astype(o_ref.dtype)


# -----------------------------------------------------------------------------
# Public wrapper: NCHW in, (N, Lv[4]) out. One pallas_call, grid over the batch.
# -----------------------------------------------------------------------------
def encoder_forward(params, x_nchw, *, ks, pools=(2, 4, 4)):
    N, cin0, H, W = x_nchw.shape
    assert cin0 == 1, "Encoder(dim=2) expects a single input channel"
    assert ks % 2 == 1, "even kernel sizes not supported"  # TODO(synk): even ks
    pad = math.ceil((ks - 1) / 2)

    x = x_nchw[:, 0, :, :].astype(jnp.float32)               # (N, H, W): W in lanes

    chans = [1] + [int(params[f"w{l}"].shape[-1]) for l in range(len(pools))]
    layer_dims = []
    operands = [x]
    in_specs = [pl.BlockSpec((1, H, W), lambda b: (b, 0, 0))]

    cur_h, cur_w = H, W
    for l, p in enumerate(pools):
        cin, cout = chans[l], chans[l + 1]
        assert cur_h % p == 0 and cur_w % p == 0, \
            "spatial dims must divide the pools"  # TODO(synk): PyTorch floor-drops
        layer_dims.append((cur_h, cur_w, cin, cout, p))
        mb = _banded_conv_mats(params[f"w{l}"], cur_w)        # (ks, W*cin, W*cout)
        sct = jnp.tile(params[f"scale{l}"].reshape(-1), cur_w).reshape(1, cur_w * cout)
        sht = jnp.tile(params[f"shift{l}"].reshape(-1), cur_w).reshape(1, cur_w * cout)
        selw = _wpool_select_mats(cur_w, cout, p)             # (p, W*cout, Wp*cout)
        selh = _hpool_select_mats(cur_h, p)                   # (p, Ho, H)
        for arr in (mb, sct, sht, selw, selh):
            operands.append(arr)
            in_specs.append(_full_spec(arr.shape))
        cur_h, cur_w = cur_h // p, cur_w // p

    c_last = chans[-1]
    avg_mat = jnp.kron(jnp.full((cur_w, 1), 1.0 / cur_w, jnp.float32),
                       jnp.eye(c_last, dtype=jnp.float32))    # (Wo*C, C) lane averager
    for arr in (avg_mat, params["fw1"], params["fb1"], params["fw2"], params["fb2"]):
        operands.append(arr)
        in_specs.append(_full_spec(arr.shape))

    out_dim = int(params["fw2"].shape[-1])
    kernel = functools.partial(_encoder_kernel, layer_dims=tuple(layer_dims),
                               ks=ks, pad=pad)
    out = pl.pallas_call(
        kernel,
        out_shape=jax.ShapeDtypeStruct((N, 1, out_dim), jnp.float32),
        grid=(N,),
        in_specs=in_specs,
        out_specs=pl.BlockSpec((1, 1, out_dim), lambda b: (b, 0, 0)),
        compiler_params=pltpu.CompilerParams(
            dimension_semantics=("parallel",)),               # v7x: 2 TCs split batch
    )(*operands)
    return out[:, 0, :]


# -----------------------------------------------------------------------------
# Parameter init (BN folded eval-mode) and a pure-JAX reference.
# -----------------------------------------------------------------------------
def init_params(key, Lv, ks):
    eps = 1e-5
    chans = [1, Lv[0], Lv[1], Lv[2]]
    params = {}
    keys = jax.random.split(key, 32)
    ki = 0
    for l in range(3):
        cin, cout = chans[l], chans[l + 1]
        w = 0.1 * jax.random.normal(keys[ki], (ks, ks, cin, cout), jnp.float32); ki += 1
        b = 0.1 * jax.random.normal(keys[ki], (cout,), jnp.float32); ki += 1
        gamma = 1.0 + 0.1 * jax.random.normal(keys[ki], (cout,), jnp.float32); ki += 1
        beta = 0.1 * jax.random.normal(keys[ki], (cout,), jnp.float32); ki += 1
        mean = 0.1 * jax.random.normal(keys[ki], (cout,), jnp.float32); ki += 1
        var = jnp.abs(1.0 + 0.1 * jax.random.normal(keys[ki], (cout,), jnp.float32)); ki += 1
        scale = gamma / jnp.sqrt(var + eps)
        shift = beta + (b - mean) * scale
        params[f"w{l}"] = w
        params[f"scale{l}"] = scale                            # (cout,)
        params[f"shift{l}"] = shift                            # (cout,)
    params["fw1"] = 0.1 * jax.random.normal(keys[ki], (Lv[2], Lv[3]), jnp.float32); ki += 1
    params["fb1"] = 0.1 * jax.random.normal(keys[ki], (1, Lv[3]), jnp.float32); ki += 1
    params["fw2"] = 0.1 * jax.random.normal(keys[ki], (Lv[3], Lv[4]), jnp.float32); ki += 1
    params["fb2"] = 0.1 * jax.random.normal(keys[ki], (1, Lv[4]), jnp.float32); ki += 1
    return params


def reference_forward(params, x_nchw, *, ks):
    """Pure-JAX reference (eval-mode BN folded identically), f32/HIGHEST precision."""
    x = jnp.transpose(x_nchw, (0, 2, 3, 1))
    pad = math.ceil((ks - 1) / 2)
    for l, p in enumerate((2, 4, 4)):
        y = jax.lax.conv_general_dilated(
            x, params[f"w{l}"], window_strides=(1, 1),
            padding=[(pad, pad), (pad, pad)],
            dimension_numbers=("NHWC", "HWIO", "NHWC"),
            precision=jax.lax.Precision.HIGHEST)
        y = y * params[f"scale{l}"] + params[f"shift{l}"]
        y = jnp.maximum(y, 0.0)
        x = jax.lax.reduce_window(y, -jnp.inf, jax.lax.max,
                                  (1, p, p, 1), (1, p, p, 1), "VALID")
    pooled = jnp.mean(x, axis=(1, 2))
    h = jnp.maximum(pooled @ params["fw1"] + params["fb1"], 0.0)
    return h @ params["fw2"] + params["fb2"]


if __name__ == "__main__":
    Lv = [4, 8, 16, 16, 8]          # [conv1, conv2, conv3, fc_hidden, fc_out]
    ks = 3
    N, H, W = 2, 32, 32             # 32 -> pool2 -> 16 -> pool4 -> 4 -> pool4 -> 1

    key = jax.random.PRNGKey(0)
    kx, kp = jax.random.split(key)
    x = jax.random.normal(kx, (N, 1, H, W), jnp.float32)   # NCHW, like PyTorch
    params = init_params(kp, Lv, ks)

    fwd = jax.jit(functools.partial(encoder_forward, ks=ks))
    out = jax.block_until_ready(fwd(params, x))
    assert out.shape == (N, Lv[4])

    # Reference at f32/HIGHEST; kernel uses default MXU precision (the 0/1
    # selection matmuls are exact), so compare at bf16-pass tolerance.
    ref = reference_forward(params, x, ks=ks)
    np.testing.assert_allclose(np.asarray(out), np.asarray(ref),
                               rtol=2e-2, atol=2e-2)
    print("KERNEL_OK")
</pallas_src>

<mosaic_0001>
module attributes {stable_mosaic.version = 11 : i64} {
  func.func @_encoder_kernel(%arg0: i32, %arg1: memref<1x32x32xf32, #tpu.memory_space<vmem>>, %arg2: memref<3x32x128xf32, #tpu.memory_space<vmem>>, %arg3: memref<1x128xf32, #tpu.memory_space<vmem>>, %arg4: memref<1x128xf32, #tpu.memory_space<vmem>>, %arg5: memref<2x128x64xf32, #tpu.memory_space<vmem>>, %arg6: memref<2x16x32xf32, #tpu.memory_space<vmem>>, %arg7: memref<3x64x128xf32, #tpu.memory_space<vmem>>, %arg8: memref<1x128xf32, #tpu.memory_space<vmem>>, %arg9: memref<1x128xf32, #tpu.memory_space<vmem>>, %arg10: memref<4x128x32xf32, #tpu.memory_space<vmem>>, %arg11: memref<4x4x16xf32, #tpu.memory_space<vmem>>, %arg12: memref<3x32x64xf32, #tpu.memory_space<vmem>>, %arg13: memref<1x64xf32, #tpu.memory_space<vmem>>, %arg14: memref<1x64xf32, #tpu.memory_space<vmem>>, %arg15: memref<4x64x16xf32, #tpu.memory_space<vmem>>, %arg16: memref<4x1x4xf32, #tpu.memory_space<vmem>>, %arg17: memref<16x16xf32, #tpu.memory_space<vmem>>, %arg18: memref<16x16xf32, #tpu.memory_space<vmem>>, %arg19: memref<1x16xf32, #tpu.memory_space<vmem>>, %arg20: memref<16x8xf32, #tpu.memory_space<vmem>>, %arg21: memref<1x8xf32, #tpu.memory_space<vmem>>, %arg22: memref<1x1x8xf32, #tpu.memory_space<vmem>>) attributes {dimension_semantics = [#tpu.dimension_semantics<parallel>], iteration_bounds = array<i64: 2>, scalar_prefetch = 0 : i64, scratch_operands = 0 : i64, tpu.core_type = #tpu.core_type<tc>, window_params = [{transform_indices = @transform_0, window_bounds = array<i64: 1, 32, 32>}, {pipeline_mode = #tpu.pipeline_mode<synchronous>, transform_indices = @transform_1, window_bounds = array<i64: 3, 32, 128>}, {pipeline_mode = #tpu.pipeline_mode<synchronous>, transform_indices = @transform_2, window_bounds = array<i64: 1, 128>}, {pipeline_mode = #tpu.pipeline_mode<synchronous>, transform_indices = @transform_3, window_bounds = array<i64: 1, 128>}, {pipeline_mode = #tpu.pipeline_mode<synchronous>, transform_indices = @transform_4, window_bounds = array<i64: 2, 128, 64>}, {pipeline_mode = #tpu.pipeline_mode<synchronous>, transform_indices = @transform_5, window_bounds = array<i64: 2, 16, 32>}, {pipeline_mode = #tpu.pipeline_mode<synchronous>, transform_indices = @transform_6, window_bounds = array<i64: 3, 64, 128>}, {pipeline_mode = #tpu.pipeline_mode<synchronous>, transform_indices = @transform_7, window_bounds = array<i64: 1, 128>}, {pipeline_mode = #tpu.pipeline_mode<synchronous>, transform_indices = @transform_8, window_bounds = array<i64: 1, 128>}, {pipeline_mode = #tpu.pipeline_mode<synchronous>, transform_indices = @transform_9, window_bounds = array<i64: 4, 128, 32>}, {pipeline_mode = #tpu.pipeline_mode<synchronous>, transform_indices = @transform_10, window_bounds = array<i64: 4, 4, 16>}, {pipeline_mode = #tpu.pipeline_mode<synchronous>, transform_indices = @transform_11, window_bounds = array<i64: 3, 32, 64>}, {pipeline_mode = #tpu.pipeline_mode<synchronous>, transform_indices = @transform_12, window_bounds = array<i64: 1, 64>}, {pipeline_mode = #tpu.pipeline_mode<synchronous>, transform_indices = @transform_13, window_bounds = array<i64: 1, 64>}, {pipeline_mode = #tpu.pipeline_mode<synchronous>, transform_indices = @transform_14, window_bounds = array<i64: 4, 64, 16>}, {pipeline_mode = #tpu.pipeline_mode<synchronous>, transform_indices = @transform_15, window_bounds = array<i64: 4, 1, 4>}, {pipeline_mode = #tpu.pipeline_mode<synchronous>, transform_indices = @transform_16, window_bounds = array<i64: 16, 16>}, {pipeline_mode = #tpu.pipeline_mode<synchronous>, transform_indices = @transform_17, window_bounds = array<i64: 16, 16>}, {pipeline_mode = #tpu.pipeline_mode<synchronous>, transform_indices = @transform_18, window_bounds = array<i64: 1, 16>}, {pipeline_mode = #tpu.pipeline_mode<synchronous>, transform_indices = @transform_19, window_bounds = array<i64: 16, 8>}, {pipeline_mode = #tpu.pipeline_mode<synchronous>, transform_indices = @transform_20, window_bounds = array<i64: 1, 8>}, {transform_indices = @transform_21, window_bounds = array<i64: 1, 1, 8>}]} {
    %c0 = arith.constant 0 : index
    %c0_0 = arith.constant 0 : index
    %c0_1 = arith.constant 0 : index
    %0 = vector.load %arg1[%c0, %c0_0, %c0_1] : memref<1x32x32xf32, #tpu.memory_space<vmem>>, vector<1x32x32xf32>
    %1 = vector.shape_cast %0 : vector<1x32x32xf32> to vector<32x32xf32>
    %cst = arith.constant 0.000000e+00 : f32
    %2 = vector.broadcast %cst : f32 to vector<1x32xf32>
    %3 = tpu.concatenate %2, %1, %2 in 0 : vector<1x32xf32>, vector<32x32xf32>, vector<1x32xf32> -> vector<34x32xf32>
    %cst_2 = arith.constant 0.000000e+00 : f32
    %4 = vector.broadcast %cst_2 : f32 to vector<32x128xf32>
    %5 = vector.extract_strided_slice %3 {offsets = [0, 0], sizes = [32, 32], strides = [1, 1]} : vector<34x32xf32> to vector<32x32xf32>
    %c0_3 = arith.constant 0 : index
    %c0_4 = arith.constant 0 : index
    %c0_5 = arith.constant 0 : index
    %6 = vector.load %arg2[%c0_3, %c0_4, %c0_5] : memref<3x32x128xf32, #tpu.memory_space<vmem>>, vector<1x32x128xf32>
    %7 = vector.shape_cast %6 : vector<1x32x128xf32> to vector<32x128xf32>
    %cst_6 = arith.constant dense<0.000000e+00> : vector<32x128xf32>
    %8 = tpu.matmul %5, %7, %cst_6 {dimension_numbers = #tpu.dot_dimension_numbers<[1], [0], [0], [1], [0, 0, 1, 1], [], []>} : vector<32x32xf32>, vector<32x128xf32>, vector<32x128xf32> -> vector<32x128xf32>
    %9 = arith.addf %4, %8 : vector<32x128xf32>
    %10 = vector.extract_strided_slice %3 {offsets = [1, 0], sizes = [32, 32], strides = [1, 1]} : vector<34x32xf32> to vector<32x32xf32>
    %c1 = arith.constant 1 : index
    %c0_7 = arith.constant 0 : index
    %c0_8 = arith.constant 0 : index
    %11 = vector.load %arg2[%c1, %c0_7, %c0_8] : memref<3x32x128xf32, #tpu.memory_space<vmem>>, vector<1x32x128xf32>
    %12 = vector.shape_cast %11 : vector<1x32x128xf32> to vector<32x128xf32>
    %cst_9 = arith.constant dense<0.000000e+00> : vector<32x128xf32>
    %13 = tpu.matmul %10, %12, %cst_9 {dimension_numbers = #tpu.dot_dimension_numbers<[1], [0], [0], [1], [0, 0, 1, 1], [], []>} : vector<32x32xf32>, vector<32x128xf32>, vector<32x128xf32> -> vector<32x128xf32>
    %14 = arith.addf %9, %13 : vector<32x128xf32>
    %15 = vector.extract_strided_slice %3 {offsets = [2, 0], sizes = [32, 32], strides = [1, 1]} : vector<34x32xf32> to vector<32x32xf32>
    %c2 = arith.constant 2 : index
    %c0_10 = arith.constant 0 : index
    %c0_11 = arith.constant 0 : index
    %16 = vector.load %arg2[%c2, %c0_10, %c0_11] : memref<3x32x128xf32, #tpu.memory_space<vmem>>, vector<1x32x128xf32>
    %17 = vector.shape_cast %16 : vector<1x32x128xf32> to vector<32x128xf32>
    %cst_12 = arith.constant dense<0.000000e+00> : vector<32x128xf32>
    %18 = tpu.matmul %15, %17, %cst_12 {dimension_numbers = #tpu.dot_dimension_numbers<[1], [0], [0], [1], [0, 0, 1, 1], [], []>} : vector<32x32xf32>, vector<32x128xf32>, vector<32x128xf32> -> vector<32x128xf32>
    %19 = arith.addf %14, %18 : vector<32x128xf32>
    %c0_13 = arith.constant 0 : index
    %c0_14 = arith.constant 0 : index
    %20 = vector.load %arg3[%c0_13, %c0_14] : memref<1x128xf32, #tpu.memory_space<vmem>>, vector<1x128xf32>
    %21 = vector.broadcast %20 : vector<1x128xf32> to vector<32x128xf32>
    %22 = arith.mulf %19, %21 : vector<32x128xf32>
    %c0_15 = arith.constant 0 : index
    %c0_16 = arith.constant 0 : index
    %23 = vector.load %arg4[%c0_15, %c0_16] : memref<1x128xf32, #tpu.memory_space<vmem>>, vector<1x128xf32>
    %24 = vector.broadcast %23 : vector<1x128xf32> to vector<32x128xf32>
    %25 = arith.addf %22, %24 : vector<32x128xf32>
    %cst_17 = arith.constant 0.000000e+00 : f32
    %26 = vector.broadcast %cst_17 : f32 to vector<32x128xf32>
    %27 = arith.maximumf %25, %26 : vector<32x128xf32>
    %c0_18 = arith.constant 0 : index
    %c0_19 = arith.constant 0 : index
    %c0_20 = arith.constant 0 : index
    %28 = vector.load %arg5[%c0_18, %c0_19, %c0_20] : memref<2x128x64xf32, #tpu.memory_space<vmem>>, vector<1x128x64xf32>
    %29 = vector.shape_cast %28 : vector<1x128x64xf32> to vector<128x64xf32>
    %cst_21 = arith.constant dense<0.000000e+00> : vector<32x64xf32>
    %30 = tpu.matmul %27, %29, %cst_21 {dimension_numbers = #tpu.dot_dimension_numbers<[1], [0], [0], [1], [0, 0, 1, 1], [], []>} : vector<32x128xf32>, vector<128x64xf32>, vector<32x64xf32> -> vector<32x64xf32>
    %c1_22 = arith.constant 1 : index
    %c0_23 = arith.constant 0 : index
    %c0_24 = arith.constant 0 : index
    %31 = vector.load %arg5[%c1_22, %c0_23, %c0_24] : memref<2x128x64xf32, #tpu.memory_space<vmem>>, vector<1x128x64xf32>
    %32 = vector.shape_cast %31 : vector<1x128x64xf32> to vector<128x64xf32>
    %cst_25 = arith.constant dense<0.000000e+00> : vector<32x64xf32>
    %33 = tpu.matmul %27, %32, %cst_25 {dimension_numbers = #tpu.dot_dimension_numbers<[1], [0], [0], [1], [0, 0, 1, 1], [], []>} : vector<32x128xf32>, vector<128x64xf32>, vector<32x64xf32> -> vector<32x64xf32>
    %34 = arith.maximumf %30, %33 : vector<32x64xf32>
    %c0_26 = arith.constant 0 : index
    %c0_27 = arith.constant 0 : index
    %c0_28 = arith.constant 0 : index
    %35 = vector.load %arg6[%c0_26, %c0_27, %c0_28] : memref<2x16x32xf32, #tpu.memory_space<vmem>>, vector<1x16x32xf32>
    %36 = vector.shape_cast %35 : vector<1x16x32xf32> to vector<16x32xf32>
    %cst_29 = arith.constant dense<0.000000e+00> : vector<16x64xf32>
    %37 = tpu.matmul %36, %34, %cst_29 {dimension_numbers = #tpu.dot_dimension_numbers<[1], [0], [0], [1], [0, 0, 1, 1], [], []>} : vector<16x32xf32>, vector<32x64xf32>, vector<16x64xf32> -> vector<16x64xf32>
    %c1_30 = arith.constant 1 : index
    %c0_31 = arith.constant 0 : index
    %c0_32 = arith.constant 0 : index
    %38 = vector.load %arg6[%c1_30, %c0_31, %c0_32] : memref<2x16x32xf32, #tpu.memory_space<vmem>>, vector<1x16x32xf32>
    %39 = vector.shape_cast %38 : vector<1x16x32xf32> to vector<16x32xf32>
    %cst_33 = arith.constant dense<0.000000e+00> : vector<16x64xf32>
    %40 = tpu.matmul %39, %34, %cst_33 {dimension_numbers = #tpu.dot_dimension_numbers<[1], [0], [0], [1], [0, 0, 1, 1], [], []>} : vector<16x32xf32>, vector<32x64xf32>, vector<16x64xf32> -> vector<16x64xf32>
    %41 = arith.maximumf %37, %40 : vector<16x64xf32>
    %cst_34 = arith.constant 0.000000e+00 : f32
    %42 = vector.broadcast %cst_34 : f32 to vector<1x64xf32>
    %43 = tpu.concatenate %42, %41, %42 in 0 : vector<1x64xf32>, vector<16x64xf32>, vector<1x64xf32> -> vector<18x64xf32>
    %cst_35 = arith.constant 0.000000e+00 : f32
    %44 = vector.broadcast %cst_35 : f32 to vector<16x128xf32>
    %45 = vector.extract_strided_slice %43 {offsets = [0, 0], sizes = [16, 64], strides = [1, 1]} : vector<18x64xf32> to vector<16x64xf32>
    %c0_36 = arith.constant 0 : index
    %c0_37 = arith.constant 0 : index
    %c0_38 = arith.constant 0 : index
    %46 = vector.load %arg7[%c0_36, %c0_37, %c0_38] : memref<3x64x128xf32, #tpu.memory_space<vmem>>, vector<1x64x128xf32>
    %47 = vector.shape_cast %46 : vector<1x64x128xf32> to vector<64x128xf32>
    %cst_39 = arith.constant dense<0.000000e+00> : vector<16x128xf32>
    %48 = tpu.matmul %45, %47, %cst_39 {dimension_numbers = #tpu.dot_dimension_numbers<[1], [0], [0], [1], [0, 0, 1, 1], [], []>} : vector<16x64xf32>, vector<64x128xf32>, vector<16x128xf32> -> vector<16x128xf32>
    %49 = arith.addf %44, %48 : vector<16x128xf32>
    %50 = vector.extract_strided_slice %43 {offsets = [1, 0], sizes = [16, 64], strides = [1, 1]} : vector<18x64xf32> to vector<16x64xf32>
    %c1_40 = arith.constant 1 : index
    %c0_41 = arith.constant 0 : index
    %c0_42 = arith.constant 0 : index
    %51 = vector.load %arg7[%c1_40, %c0_41, %c0_42] : memref<3x64x128xf32, #tpu.memory_space<vmem>>, vector<1x64x128xf32>
    %52 = vector.shape_cast %51 : vector<1x64x128xf32> to vector<64x128xf32>
    %cst_43 = arith.constant dense<0.000000e+00> : vector<16x128xf32>
    %53 = tpu.matmul %50, %52, %cst_43 {dimension_numbers = #tpu.dot_dimension_numbers<[1], [0], [0], [1], [0, 0, 1, 1], [], []>} : vector<16x64xf32>, vector<64x128xf32>, vector<16x128xf32> -> vector<16x128xf32>
    %54 = arith.addf %49, %53 : vector<16x128xf32>
    %55 = vector.extract_strided_slice %43 {offsets = [2, 0], sizes = [16, 64], strides = [1, 1]} : vector<18x64xf32> to vector<16x64xf32>
    %c2_44 = arith.constant 2 : index
    %c0_45 = arith.constant 0 : index
    %c0_46 = arith.constant 0 : index
    %56 = vector.load %arg7[%c2_44, %c0_45, %c0_46] : memref<3x64x128xf32, #tpu.memory_space<vmem>>, vector<1x64x128xf32>
    %57 = vector.shape_cast %56 : vector<1x64x128xf32> to vector<64x128xf32>
    %cst_47 = arith.constant dense<0.000000e+00> : vector<16x128xf32>
    %58 = tpu.matmul %55, %57, %cst_47 {dimension_numbers = #tpu.dot_dimension_numbers<[1], [0], [0], [1], [0, 0, 1, 1], [], []>} : vector<16x64xf32>, vector<64x128xf32>, vector<16x128xf32> -> vector<16x128xf32>
    %59 = arith.addf %54, %58 : vector<16x128xf32>
    %c0_48 = arith.constant 0 : index
    %c0_49 = arith.constant 0 : index
    %60 = vector.load %arg8[%c0_48, %c0_49] : memref<1x128xf32, #tpu.memory_space<vmem>>, vector<1x128xf32>
    %61 = vector.broadcast %60 : vector<1x128xf32> to vector<16x128xf32>
    %62 = arith.mulf %59, %61 : vector<16x128xf32>
    %c0_50 = arith.constant 0 : index
    %c0_51 = arith.constant 0 : index
    %63 = vector.load %arg9[%c0_50, %c0_51] : memref<1x128xf32, #tpu.memory_space<vmem>>, vector<1x128xf32>
    %64 = vector.broadcast %63 : vector<1x128xf32> to vector<16x128xf32>
    %65 = arith.addf %62, %64 : vector<16x128xf32>
    %cst_52 = arith.constant 0.000000e+00 : f32
    %66 = vector.broadcast %cst_52 : f32 to vector<16x128xf32>
    %67 = arith.maximumf %65, %66 : vector<16x128xf32>
    %c0_53 = arith.constant 0 : index
    %c0_54 = arith.constant 0 : index
    %c0_55 = arith.constant 0 : index
    %68 = vector.load %arg10[%c0_53, %c0_54, %c0_55] : memref<4x128x32xf32, #tpu.memory_space<vmem>>, vector<1x128x32xf32>
    %69 = vector.shape_cast %68 : vector<1x128x32xf32> to vector<128x32xf32>
    %cst_56 = arith.constant dense<0.000000e+00> : vector<16x32xf32>
    %70 = tpu.matmul %67, %69, %cst_56 {dimension_numbers = #tpu.dot_dimension_numbers<[1], [0], [0], [1], [0, 0, 1, 1], [], []>} : vector<16x128xf32>, vector<128x32xf32>, vector<16x32xf32> -> vector<16x32xf32>
    %c1_57 = arith.constant 1 : index
    %c0_58 = arith.constant 0 : index
    %c0_59 = arith.constant 0 : index
    %71 = vector.load %arg10[%c1_57, %c0_58, %c0_59] : memref<4x128x32xf32, #tpu.memory_space<vmem>>, vector<1x128x32xf32>
    %72 = vector.shape_cast %71 : vector<1x128x32xf32> to vector<128x32xf32>
    %cst_60 = arith.constant dense<0.000000e+00> : vector<16x32xf32>
    %73 = tpu.matmul %67, %72, %cst_60 {dimension_numbers = #tpu.dot_dimension_numbers<[1], [0], [0], [1], [0, 0, 1, 1], [], []>} : vector<16x128xf32>, vector<128x32xf32>, vector<16x32xf32> -> vector<16x32xf32>
    %74 = arith.maximumf %70, %73 : vector<16x32xf32>
    %c2_61 = arith.constant 2 : index
    %c0_62 = arith.constant 0 : index
    %c0_63 = arith.constant 0 : index
    %75 = vector.load %arg10[%c2_61, %c0_62, %c0_63] : memref<4x128x32xf32, #tpu.memory_space<vmem>>, vector<1x128x32xf32>
    %76 = vector.shape_cast %75 : vector<1x128x32xf32> to vector<128x32xf32>
    %cst_64 = arith.constant dense<0.000000e+00> : vector<16x32xf32>
    %77 = tpu.matmul %67, %76, %cst_64 {dimension_numbers = #tpu.dot_dimension_numbers<[1], [0], [0], [1], [0, 0, 1, 1], [], []>} : vector<16x128xf32>, vector<128x32xf32>, vector<16x32xf32> -> vector<16x32xf32>
    %78 = arith.maximumf %74, %77 : vector<16x32xf32>
    %c3 = arith.constant 3 : index
    %c0_65 = arith.constant 0 : index
    %c0_66 = arith.constant 0 : index
    %79 = vector.load %arg10[%c3, %c0_65, %c0_66] : memref<4x128x32xf32, #tpu.memory_space<vmem>>, vector<1x128x32xf32>
    %80 = vector.shape_cast %79 : vector<1x128x32xf32> to vector<128x32xf32>
    %cst_67 = arith.constant dense<0.000000e+00> : vector<16x32xf32>
    %81 = tpu.matmul %67, %80, %cst_67 {dimension_numbers = #tpu.dot_dimension_numbers<[1], [0], [0], [1], [0, 0, 1, 1], [], []>} : vector<16x128xf32>, vector<128x32xf32>, vector<16x32xf32> -> vector<16x32xf32>
    %82 = arith.maximumf %78, %81 : vector<16x32xf32>
    %c0_68 = arith.constant 0 : index
    %c0_69 = arith.constant 0 : index
    %c0_70 = arith.constant 0 : index
    %83 = vector.load %arg11[%c0_68, %c0_69, %c0_70] : memref<4x4x16xf32, #tpu.memory_space<vmem>>, vector<1x4x16xf32>
    %84 = vector.shape_cast %83 : vector<1x4x16xf32> to vector<4x16xf32>
    %cst_71 = arith.constant dense<0.000000e+00> : vector<4x32xf32>
    %85 = tpu.matmul %84, %82, %cst_71 {dimension_numbers = #tpu.dot_dimension_numbers<[1], [0], [0], [1], [0, 0, 1, 1], [], []>} : vector<4x16xf32>, vector<16x32xf32>, vector<4x32xf32> -> vector<4x32xf32>
    %c1_72 = arith.constant 1 : index
    %c0_73 = arith.constant 0 : index
    %c0_74 = arith.constant 0 : index
    %86 = vector.load %arg11[%c1_72, %c0_73, %c0_74] : memref<4x4x16xf32, #tpu.memory_space<vmem>>, vector<1x4x16xf32>
    %87 = vector.shape_cast %86 : vector<1x4x16xf32> to vector<4x16xf32>
    %cst_75 = arith.constant dense<0.000000e+00> : vector<4x32xf32>
    %88 = tpu.matmul %87, %82, %cst_75 {dimension_numbers = #tpu.dot_dimension_numbers<[1], [0], [0], [1], [0, 0, 1, 1], [], []>} : vector<4x16xf32>, vector<16x32xf32>, vector<4x32xf32> -> vector<4x32xf32>
    %89 = arith.maximumf %85, %88 : vector<4x32xf32>
    %c2_76 = arith.constant 2 : index
    %c0_77 = arith.constant 0 : index
    %c0_78 = arith.constant 0 : index
    %90 = vector.load %arg11[%c2_76, %c0_77, %c0_78] : memref<4x4x16xf32, #tpu.memory_space<vmem>>, vector<1x4x16xf32>
    %91 = vector.shape_cast %90 : vector<1x4x16xf32> to vector<4x16xf32>
    %cst_79 = arith.constant dense<0.000000e+00> : vector<4x32xf32>
    %92 = tpu.matmul %91, %82, %cst_79 {dimension_numbers = #tpu.dot_dimension_numbers<[1], [0], [0], [1], [0, 0, 1, 1], [], []>} : vector<4x16xf32>, vector<16x32xf32>, vector<4x32xf32> -> vector<4x32xf32>
    %93 = arith.maximumf %89, %92 : vector<4x32xf32>
    %c3_80 = arith.constant 3 : index
    %c0_81 = arith.constant 0 : index
    %c0_82 = arith.constant 0 : index
    %94 = vector.load %arg11[%c3_80, %c0_81, %c0_82] : memref<4x4x16xf32, #tpu.memory_space<vmem>>, vector<1x4x16xf32>
    %95 = vector.shape_cast %94 : vector<1x4x16xf32> to vector<4x16xf32>
    %cst_83 = arith.constant dense<0.000000e+00> : vector<4x32xf32>
    %96 = tpu.matmul %95, %82, %cst_83 {dimension_numbers = #tpu.dot_dimension_numbers<[1], [0], [0], [1], [0, 0, 1, 1], [], []>} : vector<4x16xf32>, vector<16x32xf32>, vector<4x32xf32> -> vector<4x32xf32>
    %97 = arith.maximumf %93, %96 : vector<4x32xf32>
    %cst_84 = arith.constant 0.000000e+00 : f32
    %98 = vector.broadcast %cst_84 : f32 to vector<1x32xf32>
    %99 = tpu.concatenate %98, %97, %98 in 0 : vector<1x32xf32>, vector<4x32xf32>, vector<1x32xf32> -> vector<6x32xf32>
    %cst_85 = arith.constant 0.000000e+00 : f32
    %100 = vector.broadcast %cst_85 : f32 to vector<4x64xf32>
    %101 = vector.extract_strided_slice %99 {offsets = [0, 0], sizes = [4, 32], strides = [1, 1]} : vector<6x32xf32> to vector<4x32xf32>
    %c0_86 = arith.constant 0 : index
    %c0_87 = arith.constant 0 : index
    %c0_88 = arith.constant 0 : index
    %102 = vector.load %arg12[%c0_86, %c0_87, %c0_88] : memref<3x32x64xf32, #tpu.memory_space<vmem>>, vector<1x32x64xf32>
    %103 = vector.shape_cast %102 : vector<1x32x64xf32> to vector<32x64xf32>
    %cst_89 = arith.constant dense<0.000000e+00> : vector<4x64xf32>
    %104 = tpu.matmul %101, %103, %cst_89 {dimension_numbers = #tpu.dot_dimension_numbers<[1], [0], [0], [1], [0, 0, 1, 1], [], []>} : vector<4x32xf32>, vector<32x64xf32>, vector<4x64xf32> -> vector<4x64xf32>
    %105 = arith.addf %100, %104 : vector<4x64xf32>
    %106 = vector.extract_strided_slice %99 {offsets = [1, 0], sizes = [4, 32], strides = [1, 1]} : vector<6x32xf32> to vector<4x32xf32>
    %c1_90 = arith.constant 1 : index
    %c0_91 = arith.constant 0 : index
    %c0_92 = arith.constant 0 : index
    %107 = vector.load %arg12[%c1_90, %c0_91, %c0_92] : memref<3x32x64xf32, #tpu.memory_space<vmem>>, vector<1x32x64xf32>
    %108 = vector.shape_cast %107 : vector<1x32x64xf32> to vector<32x64xf32>
    %cst_93 = arith.constant dense<0.000000e+00> : vector<4x64xf32>
    %109 = tpu.matmul %106, %108, %cst_93 {dimension_numbers = #tpu.dot_dimension_numbers<[1], [0], [0], [1], [0, 0, 1, 1], [], []>} : vector<4x32xf32>, vector<32x64xf32>, vector<4x64xf32> -> vector<4x64xf32>
    %110 = arith.addf %105, %109 : vector<4x64xf32>
    %111 = vector.extract_strided_slice %99 {offsets = [2, 0], sizes = [4, 32], strides = [1, 1]} : vector<6x32xf32> to vector<4x32xf32>
    %c2_94 = arith.constant 2 : index
    %c0_95 = arith.constant 0 : index
    %c0_96 = arith.constant 0 : index
    %112 = vector.load %arg12[%c2_94, %c0_95, %c0_96] : memref<3x32x64xf32, #tpu.memory_space<vmem>>, vector<1x32x64xf32>
    %113 = vector.shape_cast %112 : vector<1x32x64xf32> to vector<32x64xf32>
    %cst_97 = arith.constant dense<0.000000e+00> : vector<4x64xf32>
    %114 = tpu.matmul %111, %113, %cst_97 {dimension_numbers = #tpu.dot_dimension_numbers<[1], [0], [0], [1], [0, 0, 1, 1], [], []>} : vector<4x32xf32>, vector<32x64xf32>, vector<4x64xf32> -> vector<4x64xf32>
    %115 = arith.addf %110, %114 : vector<4x64xf32>
    %c0_98 = arith.constant 0 : index
    %c0_99 = arith.constant 0 : index
    %116 = vector.load %arg13[%c0_98, %c0_99] : memref<1x64xf32, #tpu.memory_space<vmem>>, vector<1x64xf32>
    %117 = vector.broadcast %116 : vector<1x64xf32> to vector<4x64xf32>
    %118 = arith.mulf %115, %117 : vector<4x64xf32>
    %c0_100 = arith.constant 0 : index
    %c0_101 = arith.constant 0 : index
    %119 = vector.load %arg14[%c0_100, %c0_101] : memref<1x64xf32, #tpu.memory_space<vmem>>, vector<1x64xf32>
    %120 = vector.broadcast %119 : vector<1x64xf32> to vector<4x64xf32>
    %121 = arith.addf %118, %120 : vector<4x64xf32>
    %cst_102 = arith.constant 0.000000e+00 : f32
    %122 = vector.broadcast %cst_102 : f32 to vector<4x64xf32>
    %123 = arith.maximumf %121, %122 : vector<4x64xf32>
    %c0_103 = arith.constant 0 : index
    %c0_104 = arith.constant 0 : index
    %c0_105 = arith.constant 0 : index
    %124 = vector.load %arg15[%c0_103, %c0_104, %c0_105] : memref<4x64x16xf32, #tpu.memory_space<vmem>>, vector<1x64x16xf32>
    %125 = vector.shape_cast %124 : vector<1x64x16xf32> to vector<64x16xf32>
    %cst_106 = arith.constant dense<0.000000e+00> : vector<4x16xf32>
    %126 = tpu.matmul %123, %125, %cst_106 {dimension_numbers = #tpu.dot_dimension_numbers<[1], [0], [0], [1], [0, 0, 1, 1], [], []>} : vector<4x64xf32>, vector<64x16xf32>, vector<4x16xf32> -> vector<4x16xf32>
    %c1_107 = arith.constant 1 : index
    %c0_108 = arith.constant 0 : index
    %c0_109 = arith.constant 0 : index
    %127 = vector.load %arg15[%c1_107, %c0_108, %c0_109] : memref<4x64x16xf32, #tpu.memory_space<vmem>>, vector<1x64x16xf32>
    %128 = vector.shape_cast %127 : vector<1x64x16xf32> to vector<64x16xf32>
    %cst_110 = arith.constant dense<0.000000e+00> : vector<4x16xf32>
    %129 = tpu.matmul %123, %128, %cst_110 {dimension_numbers = #tpu.dot_dimension_numbers<[1], [0], [0], [1], [0, 0, 1, 1], [], []>} : vector<4x64xf32>, vector<64x16xf32>, vector<4x16xf32> -> vector<4x16xf32>
    %130 = arith.maximumf %126, %129 : vector<4x16xf32>
    %c2_111 = arith.constant 2 : index
    %c0_112 = arith.constant 0 : index
    %c0_113 = arith.constant 0 : index
    %131 = vector.load %arg15[%c2_111, %c0_112, %c0_113] : memref<4x64x16xf32, #tpu.memory_space<vmem>>, vector<1x64x16xf32>
    %132 = vector.shape_cast %131 : vector<1x64x16xf32> to vector<64x16xf32>
    %cst_114 = arith.constant dense<0.000000e+00> : vector<4x16xf32>
    %133 = tpu.matmul %123, %132, %cst_114 {dimension_numbers = #tpu.dot_dimension_numbers<[1], [0], [0], [1], [0, 0, 1, 1], [], []>} : vector<4x64xf32>, vector<64x16xf32>, vector<4x16xf32> -> vector<4x16xf32>
    %134 = arith.maximumf %130, %133 : vector<4x16xf32>
    %c3_115 = arith.constant 3 : index
    %c0_116 = arith.constant 0 : index
    %c0_117 = arith.constant 0 : index
    %135 = vector.load %arg15[%c3_115, %c0_116, %c0_117] : memref<4x64x16xf32, #tpu.memory_space<vmem>>, vector<1x64x16xf32>
    %136 = vector.shape_cast %135 : vector<1x64x16xf32> to vector<64x16xf32>
    %cst_118 = arith.constant dense<0.000000e+00> : vector<4x16xf32>
    %137 = tpu.matmul %123, %136, %cst_118 {dimension_numbers = #tpu.dot_dimension_numbers<[1], [0], [0], [1], [0, 0, 1, 1], [], []>} : vector<4x64xf32>, vector<64x16xf32>, vector<4x16xf32> -> vector<4x16xf32>
    %138 = arith.maximumf %134, %137 : vector<4x16xf32>
    %cst_119 = arith.constant dense<0xFF800000> : vector<16xf32>
    %139 = vector.multi_reduction <maximumf>, %138, %cst_119 [0] : vector<4x16xf32> to vector<16xf32>
    %140 = vector.shape_cast %139 : vector<16xf32> to vector<1x16xf32>
    %cst_120 = arith.constant dense<0.000000e+00> : vector<16xf32>
    %141 = vector.multi_reduction <add>, %140, %cst_120 [0] : vector<1x16xf32> to vector<16xf32>
    %142 = vector.shape_cast %141 : vector<16xf32> to vector<1x16xf32>
    %cst_121 = arith.constant 1.000000e+00 : f32
    %143 = vector.broadcast %cst_121 : f32 to vector<1x16xf32>
    %144 = arith.divf %142, %143 : vector<1x16xf32>
    %c0_122 = arith.constant 0 : index
    %c0_123 = arith.constant 0 : index
    %145 = vector.load %arg17[%c0_122, %c0_123] : memref<16x16xf32, #tpu.memory_space<vmem>>, vector<16x16xf32>
    %cst_124 = arith.constant dense<0.000000e+00> : vector<1x16xf32>
    %146 = tpu.matmul %144, %145, %cst_124 {dimension_numbers = #tpu.dot_dimension_numbers<[1], [0], [0], [1], [0, 0, 1, 1], [], []>} : vector<1x16xf32>, vector<16x16xf32>, vector<1x16xf32> -> vector<1x16xf32>
    %c0_125 = arith.constant 0 : index
    %c0_126 = arith.constant 0 : index
    %147 = vector.load %arg18[%c0_125, %c0_126] : memref<16x16xf32, #tpu.memory_space<vmem>>, vector<16x16xf32>
    %cst_127 = arith.constant dense<0.000000e+00> : vector<1x16xf32>
    %148 = tpu.matmul %146, %147, %cst_127 {dimension_numbers = #tpu.dot_dimension_numbers<[1], [0], [0], [1], [0, 0, 1, 1], [], []>} : vector<1x16xf32>, vector<16x16xf32>, vector<1x16xf32> -> vector<1x16xf32>
    %c0_128 = arith.constant 0 : index
    %c0_129 = arith.constant 0 : index
    %149 = vector.load %arg19[%c0_128, %c0_129] : memref<1x16xf32, #tpu.memory_space<vmem>>, vector<1x16xf32>
    %150 = arith.addf %148, %149 : vector<1x16xf32>
    %cst_130 = arith.constant 0.000000e+00 : f32
    %151 = vector.broadcast %cst_130 : f32 to vector<1x16xf32>
    %152 = arith.maximumf %150, %151 : vector<1x16xf32>
    %c0_131 = arith.constant 0 : index
    %c0_132 = arith.constant 0 : index
    %153 = vector.load %arg20[%c0_131, %c0_132] : memref<16x8xf32, #tpu.memory_space<vmem>>, vector<16x8xf32>
    %cst_133 = arith.constant dense<0.000000e+00> : vector<1x8xf32>
    %154 = tpu.matmul %152, %153, %cst_133 {dimension_numbers = #tpu.dot_dimension_numbers<[1], [0], [0], [1], [0, 0, 1, 1], [], []>} : vector<1x16xf32>, vector<16x8xf32>, vector<1x8xf32> -> vector<1x8xf32>
    %c0_134 = arith.constant 0 : index
    %c0_135 = arith.constant 0 : index
    %155 = vector.load %arg21[%c0_134, %c0_135] : memref<1x8xf32, #tpu.memory_space<vmem>>, vector<1x8xf32>
    %156 = arith.addf %154, %155 : vector<1x8xf32>
    %157 = vector.shape_cast %156 : vector<1x8xf32> to vector<1x1x8xf32>
    %c0_136 = arith.constant 0 : index
    %c0_137 = arith.constant 0 : index
    %c0_138 = arith.constant 0 : index
    %158 = vector.load %arg22[%c0_136, %c0_137, %c0_138] : memref<1x1x8xf32, #tpu.memory_space<vmem>>, vector<1x1x8xf32>
    tpu.vector_store %arg22[%c0_136, %c0_137, %c0_138], %157 {strides = array<i32>} : memref<1x1x8xf32, #tpu.memory_space<vmem>>, vector<1x1x8xf32>,
    return
  }
  func.func @transform_0(%arg0: i32) -> (i32, i32, i32) {
    %c0_i32 = arith.constant 0 : i32
    %c0_i32_0 = arith.constant 0 : i32
    %c0_i32_1 = arith.constant 0 : i32
    return %arg0, %c0_i32, %c0_i32_0 : i32, i32, i32
  }
  func.func @transform_1(%arg0: i32) -> (i32, i32, i32) {
    %c0_i32 = arith.constant 0 : i32
    %c0_i32_0 = arith.constant 0 : i32
    %c0_i32_1 = arith.constant 0 : i32
    %c0_i32_2 = arith.constant 0 : i32
    return %c0_i32, %c0_i32_0, %c0_i32_1 : i32, i32, i32
  }
  func.func @transform_2(%arg0: i32) -> (i32, i32) {
    %c0_i32 = arith.constant 0 : i32
    %c0_i32_0 = arith.constant 0 : i32
    %c0_i32_1 = arith.constant 0 : i32
    return %c0_i32, %c0_i32_0 : i32, i32
  }
  func.func @transform_3(%arg0: i32) -> (i32, i32) {
    %c0_i32 = arith.constant 0 : i32
    %c0_i32_0 = arith.constant 0 : i32
    %c0_i32_1 = arith.constant 0 : i32
    return %c0_i32, %c0_i32_0 : i32, i32
  }
  func.func @transform_4(%arg0: i32) -> (i32, i32, i32) {
    %c0_i32 = arith.constant 0 : i32
    %c0_i32_0 = arith.constant 0 : i32
    %c0_i32_1 = arith.constant 0 : i32
    %c0_i32_2 = arith.constant 0 : i32
    return %c0_i32, %c0_i32_0, %c0_i32_1 : i32, i32, i32
  }
  func.func @transform_5(%arg0: i32) -> (i32, i32, i32) {
    %c0_i32 = arith.constant 0 : i32
    %c0_i32_0 = arith.constant 0 : i32
    %c0_i32_1 = arith.constant 0 : i32
    %c0_i32_2 = arith.constant 0 : i32
    return %c0_i32, %c0_i32_0, %c0_i32_1 : i32, i32, i32
  }
  func.func @transform_6(%arg0: i32) -> (i32, i32, i32) {
    %c0_i32 = arith.constant 0 : i32
    %c0_i32_0 = arith.constant 0 : i32
    %c0_i32_1 = arith.constant 0 : i32
    %c0_i32_2 = arith.constant 0 : i32
    return %c0_i32, %c0_i32_0, %c0_i32_1 : i32, i32, i32
  }
  func.func @transform_7(%arg0: i32) -> (i32, i32) {
    %c0_i32 = arith.constant 0 : i32
    %c0_i32_0 = arith.constant 0 : i32
    %c0_i32_1 = arith.constant 0 : i32
    return %c0_i32, %c0_i32_0 : i32, i32
  }
  func.func @transform_8(%arg0: i32) -> (i32, i32) {
    %c0_i32 = arith.constant 0 : i32
    %c0_i32_0 = arith.constant 0 : i32
    %c0_i32_1 = arith.constant 0 : i32
    return %c0_i32, %c0_i32_0 : i32, i32
  }
  func.func @transform_9(%arg0: i32) -> (i32, i32, i32) {
    %c0_i32 = arith.constant 0 : i32
    %c0_i32_0 = arith.constant 0 : i32
    %c0_i32_1 = arith.constant 0 : i32
    %c0_i32_2 = arith.constant 0 : i32
    return %c0_i32, %c0_i32_0, %c0_i32_1 : i32, i32, i32
  }
  func.func @transform_10(%arg0: i32) -> (i32, i32, i32) {
    %c0_i32 = arith.constant 0 : i32
    %c0_i32_0 = arith.constant 0 : i32
    %c0_i32_1 = arith.constant 0 : i32
    %c0_i32_2 = arith.constant 0 : i32
    return %c0_i32, %c0_i32_0, %c0_i32_1 : i32, i32, i32
  }
  func.func @transform_11(%arg0: i32) -> (i32, i32, i32) {
    %c0_i32 = arith.constant 0 : i32
    %c0_i32_0 = arith.constant 0 : i32
    %c0_i32_1 = arith.constant 0 : i32
    %c0_i32_2 = arith.constant 0 : i32
    return %c0_i32, %c0_i32_0, %c0_i32_1 : i32, i32, i32
  }
  func.func @transform_12(%arg0: i32) -> (i32, i32) {
    %c0_i32 = arith.constant 0 : i32
    %c0_i32_0 = arith.constant 0 : i32
    %c0_i32_1 = arith.constant 0 : i32
    return %c0_i32, %c0_i32_0 : i32, i32
  }
  func.func @transform_13(%arg0: i32) -> (i32, i32) {
    %c0_i32 = arith.constant 0 : i32
    %c0_i32_0 = arith.constant 0 : i32
    %c0_i32_1 = arith.constant 0 : i32
    return %c0_i32, %c0_i32_0 : i32, i32
  }
  func.func @transform_14(%arg0: i32) -> (i32, i32, i32) {
    %c0_i32 = arith.constant 0 : i32
    %c0_i32_0 = arith.constant 0 : i32
    %c0_i32_1 = arith.constant 0 : i32
    %c0_i32_2 = arith.constant 0 : i32
    return %c0_i32, %c0_i32_0, %c0_i32_1 : i32, i32, i32
  }
  func.func @transform_15(%arg0: i32) -> (i32, i32, i32) {
    %c0_i32 = arith.constant 0 : i32
    %c0_i32_0 = arith.constant 0 : i32
    %c0_i32_1 = arith.constant 0 : i32
    %c0_i32_2 = arith.constant 0 : i32
    return %c0_i32, %c0_i32_0, %c0_i32_1 : i32, i32, i32
  }
  func.func @transform_16(%arg0: i32) -> (i32, i32) {
    %c0_i32 = arith.constant 0 : i32
    %c0_i32_0 = arith.constant 0 : i32
    %c0_i32_1 = arith.constant 0 : i32
    return %c0_i32, %c0_i32_0 : i32, i32
  }
  func.func @transform_17(%arg0: i32) -> (i32, i32) {
    %c0_i32 = arith.constant 0 : i32
    %c0_i32_0 = arith.constant 0 : i32
    %c0_i32_1 = arith.constant 0 : i32
    return %c0_i32, %c0_i32_0 : i32, i32
  }
  func.func @transform_18(%arg0: i32) -> (i32, i32) {
    %c0_i32 = arith.constant 0 : i32
    %c0_i32_0 = arith.constant 0 : i32
    %c0_i32_1 = arith.constant 0 : i32
    return %c0_i32, %c0_i32_0 : i32, i32
  }
  func.func @transform_19(%arg0: i32) -> (i32, i32) {
    %c0_i32 = arith.constant 0 : i32
    %c0_i32_0 = arith.constant 0 : i32
    %c0_i32_1 = arith.constant 0 : i32
    return %c0_i32, %c0_i32_0 : i32, i32
  }
  func.func @transform_20(%arg0: i32) -> (i32, i32) {
    %c0_i32 = arith.constant 0 : i32
    %c0_i32_0 = arith.constant 0 : i32
    %c0_i32_1 = arith.constant 0 : i32
    return %c0_i32, %c0_i32_0 : i32, i32
  }
  func.func @transform_21(%arg0: i32) -> (i32, i32, i32) {
    %c0_i32 = arith.constant 0 : i32
    %c0_i32_0 = arith.constant 0 : i32
    %c0_i32_1 = arith.constant 0 : i32
    return %arg0, %c0_i32, %c0_i32_0 : i32, i32, i32
  }
}

</mosaic_0001>

<bundles_post_ra>
// kernel: tile.33
= control target key start
LH: loop header
LB: loop body
LE: loop exit
PB: predicated region body
PF: predicated region fallthrough
CT: control target
= control target key end

     0   :  { %s40_s0 = inlined_call_operand.vmem [shape: f32[4], index: 0, kind: input, shape index: {}]   ;;  %s41_s1 = inlined_call_operand.vmem [shape: f32[32,4], index: 1, kind: output, shape index: {}]  }
   0x1   :  { %v4_v0 = vld [vmem:[%s40_s0] ss:$0 sm:$0xff] }
   0x2   :  { %5 = vst [vmem:[%s41_s1] sm:$0xff] %v4_v0 }
   0x3   :  { %12 = vst [vmem:[%s41_s1 + $0x8] sm:$0xff] %v4_v0 }
   0x4   :  { %13 = vst [vmem:[%s41_s1 + $0x10] sm:$0xff] %v4_v0 }
   0x5   :  { %14 = vst [vmem:[%s41_s1 + $0x18] sm:$0xff] %v4_v0 }

// kernel: tile.34
= control target key start
LH: loop header
LB: loop body
LE: loop exit
PB: predicated region body
PF: predicated region fallthrough
CT: control target
= control target key end

     0   :  { %s259_s10 = smov 124   ;;  %s260_s11 = smov 116   ;;  %vm3_vm0 = vcmask 31744   ;;  %vm9_vm1 = vcmask 1048544   ;;  %vm15_vm2 = vcmask 1015744   ;;  %vm21_vm3 = vcmask 982944   ;;  %s399_s0 = inlined_call_operand.vmem [shape: f32[32,4], index: 0, kind: input, shape index: {}]   ;;  %s400_s1 = inlined_call_operand.vmem [shape: f32[1,128], index: 1, kind: output, shape index: {}]  }
   0x1   :  { %v197_v0 = vld [vmem:[%s399_s0 + $0x1f] sm:$0x1]   ;;  %v199_v1 = vld [vmem:[%s399_s0 + $0x1d] sm:$0x1]   ;;  %v201_v2 = vld [vmem:[%s399_s0 + $0x1b] sm:$0x1]  }
   0x2   :  { %7 = vrot.lane.b32.xlu0 %v197_v0, %s259_s10  ;;  %19 = vrot.lane.b32.xlu1 %v199_v1, %s260_s11  ;;  %s261_s14 = smov 108   ;;  %v198_v3 = vld [vmem:[%s399_s0 + $0x1e] sm:$0x1]   ;;  %v200_v4 = vld [vmem:[%s399_s0 + $0x1c] sm:$0x1]   ;;  %s262_s19 = smov 120  }
   0x3   :  { %31 = vrot.lane.b32.xlu2 %v201_v2, %s261_s14  ;;  %s263_s20 = smov 112   ;;  %v202_v5 = vld [vmem:[%s399_s0 + $0x1a] sm:$0x1]   ;;  %s264_s23 = smov 104   ;;  %v203_v6 = vld [vmem:[%s399_s0 + $0x19] sm:$0x1]  }
   0x4   :  { %v204_v7 = vld [vmem:[%s399_s0 + $0x18] sm:$0x1]   ;;  %s265_s28 = smov 100   ;;  %s266_s29 = smov 96   ;;  %v205_v8 = vld [vmem:[%s399_s0 + $0x17] sm:$0x1]  }
   0x5   :  { %s267_s3 = smov 92   ;;  %v206_v9 = vld [vmem:[%s399_s0 + $0x16] sm:$0x1]   ;;  %v207_v10 = vld [vmem:[%s399_s0 + $0x15] sm:$0x1]   ;;  %s268_s8 = smov 88  }
   0x6   :  { %s269_s9 = smov 84   ;;  %v208_v11 = vld [vmem:[%s399_s0 + $0x14] sm:$0x1]   ;;  %s270_s12 = smov 80   ;;  %v209_v12 = vld [vmem:[%s399_s0 + $0x13] sm:$0x1]  }
   0x7   :  { %v210_v13 = vld [vmem:[%s399_s0 + $0x12] sm:$0x1]   ;;  %s271_s17 = smov 76   ;;  %s272_s18 = smov 72   ;;  %v211_v14 = vld [vmem:[%s399_s0 + $0x11] sm:$0x1]  }
   0x8   :  { %s273_s21 = smov 68   ;;  %v212_v15 = vld [vmem:[%s399_s0 + $0x10] sm:$0x1]   ;;  %v213_v16 = vld [vmem:[%s399_s0 + $0xf] sm:$0x1]   ;;  %s274_s26 = smov 64  }
   0x9   :  { %s275_s27 = smov 60   ;;  %v214_v17 = vld [vmem:[%s399_s0 + $0xe] sm:$0x1]   ;;  %s276_s30 = smov 56   ;;  %v215_v18 = vld [vmem:[%s399_s0 + $0xd] sm:$0x1]  }
   0xa   :  { %13 = vrot.lane.b32.xlu0 %v198_v3, %s262_s19  ;;  %25 = vrot.lane.b32.xlu1 %v200_v4, %s263_s20  ;;  %v216_v19 = vld [vmem:[%s399_s0 + $0xc] sm:$0x1]   ;;  %s277_s6 = smov 52   ;;  %s278_s7 = smov 48   ;;  %v217_v20 = vld [vmem:[%s399_s0 + $0xb] sm:$0x1]  }
   0xb   :  { %37 = vrot.lane.b32.xlu2 %v202_v5, %s264_s23  ;;  %s279_s10 = smov 44   ;;  %v218_v21 = vld [vmem:[%s399_s0 + $0xa] sm:$0x1]   ;;  %v219_v22 = vld [vmem:[%s399_s0 + $0x9] sm:$0x1]   ;;  %s280_s15 = smov 40  }
   0xc   :  { %s281_s16 = smov 36   ;;  %v220_v23 = vld [vmem:[%s399_s0 + $0x8] sm:$0x1]   ;;  %s282_s19 = smov 32   ;;  %v221_v24 = vld [vmem:[%s399_s0 + $0x7] sm:$0x1]  }
   0xd   :  { %v222_v25 = vld [vmem:[%s399_s0 + $0x6] sm:$0x1]   ;;  %s283_s24 = smov 28   ;;  %s284_s25 = smov 24   ;;  %v223_v26 = vld [vmem:[%s399_s0 + $0x5] sm:$0x1]  }
   0xe   :  { %v224_v27 = vld [vmem:[%s399_s0 + $0x4] sm:$0x1]   ;;  %v225_v28 = vld [vmem:[%s399_s0 + $0x3] sm:$0x1]   ;;  %s286_s4 = smov 16   ;;  %s287_s5 = smov 12  }
   0xf   :  { %v226_v29 = vld [vmem:[%s399_s0 + $0x2] sm:$0x1]   ;;  %v227_v30 = vld [vmem:[%s399_s0 + $0x1] sm:$0x1]   ;;  %s289_s11 = smov 4   ;;  %vm27_vm4 = vcmask 950144  }
  0x10   :  { %v2_v31 = vld [vmem:[%s399_s0] sm:$0x1]   ;;  %vm33_vm5 = vcmask 917344   ;;  %vm39_vm6 = vcmask 884544   ;;  %vm45_vm7 = vcmask 851744   ;;  %vm51_vm8 = vcmask 818944  }
  0x11   :  { %4 = vst.msk [vmem:[#allocation0] sm:$0x1] %vm3_vm0, %v2_v31   ;;  %vm57_vm9 = vcmask 786144   ;;  %vm63_vm10 = vcmask 753344   ;;  %vm69_vm11 = vcmask 720544   ;;  %vm75_vm12 = vcmask 687744  }
  0x12   :  { %43 = vrot.lane.b32.xlu0 %v203_v6, %s265_s28  ;;  %49 = vrot.lane.b32.xlu1 %v204_v7, %s266_s29  ;;  %s285_s28 = smov 20   ;;  %vm81_vm13 = vcmask 654944   ;;  %vm87_vm14 = vcmask 622144   ;;  %vm93_vm15 = vcmask 589344   ;;  %vm99_vm0 = vcmask 556544  }
  0x13   :  { %55 = vrot.lane.b32.xlu2 %v205_v8, %s267_s3 }
  0x1a   :  { %61 = vrot.lane.b32.xlu0 %v206_v9, %s268_s8  ;;  %67 = vrot.lane.b32.xlu1 %v207_v10, %s269_s9  ;;  %s288_s8 = smov 8  }
  0x1b   :  { %73 = vrot.lane.b32.xlu2 %v208_v11, %s270_s12 }
  0x22   :  { %79 = vrot.lane.b32.xlu0 %v209_v12, %s271_s17  ;;  %85 = vrot.lane.b32.xlu1 %v210_v13, %s272_s18 }
  0x23   :  { %91 = vrot.lane.b32.xlu2 %v211_v14, %s273_s21 }
  0x2a   :  { %97 = vrot.lane.b32.xlu0 %v212_v15, %s274_s26  ;;  %103 = vrot.lane.b32.xlu1 %v213_v16, %s275_s27 }
  0x2b   :  { %109 = vrot.lane.b32.xlu2 %v214_v17, %s276_s30 }
  0x32   :  { %115 = vrot.lane.b32.xlu0 %v215_v18, %s277_s6  ;;  %121 = vrot.lane.b32.xlu1 %v216_v19, %s278_s7 }
  0x33   :  { %127 = vrot.lane.b32.xlu2 %v217_v20, %s279_s10 }
  0x3a   :  { %133 = vrot.lane.b32.xlu0 %v218_v21, %s280_s15  ;;  %139 = vrot.lane.b32.xlu1 %v219_v22, %s281_s16 }
  0x3b   :  { %145 = vrot.lane.b32.xlu2 %v220_v23, %s282_s19 }
  0x42   :  { %151 = vrot.lane.b32.xlu0 %v221_v24, %s283_s24  ;;  %157 = vrot.lane.b32.xlu1 %v222_v25, %s284_s25 }
  0x43   :  { %163 = vrot.lane.b32.xlu2 %v223_v26, %s285_s28 }
  0x4a   :  { %169 = vrot.lane.b32.xlu0 %v224_v27, %s286_s4  ;;  %175 = vrot.lane.b32.xlu1 %v225_v28, %s287_s5 }
  0x4b   :  { %181 = vrot.lane.b32.xlu2 %v226_v29, %s288_s8 }
  0x52   :  { %187 = vrot.lane.b32.xlu0 %v227_v30, %s289_s11 }
  0x5d   :  { %v32_v32 = vpop.permute.xlu2 %31  }
  0x65   :  { %v38_v33 = vpop.permute.xlu2 %37  }
  0x6d   :  { %v56_v34 = vpop.permute.xlu2 %55  }
  0x74   :  { %v8_v35 = vpop.permute.xlu0 %7   ;;  %v20_v36 = vpop.permute.xlu1 %19  }
  0x75   :  { %10 = vst.msk [vmem:[#allocation0] sm:$0x1] %vm9_vm1, %v8_v35   ;;  %v74_v37 = vpop.permute.xlu2 %73   ;;  %vm105_vm1 = vcmask 523744  }
  0x7c   :  { %v14_v38 = vpop.permute.xlu0 %13   ;;  %v26_v39 = vpop.permute.xlu1 %25  }
  0x7d   :  { %16 = vst.msk [vmem:[#allocation0] sm:$0x1] %vm15_vm2, %v14_v38   ;;  %v92_v40 = vpop.permute.xlu2 %91   ;;  %vm111_vm2 = vcmask 490944  }
  0x7e   :  { %22 = vst.msk [vmem:[#allocation0] sm:$0x1] %vm21_vm3, %v20_v36   ;;  %vm117_vm3 = vcmask 458144  }
  0x7f   :  { %28 = vst.msk [vmem:[#allocation0] sm:$0x1] %vm27_vm4, %v26_v39   ;;  %vm123_vm4 = vcmask 425344  }
  0x80   :  { %34 = vst.msk [vmem:[#allocation0] sm:$0x1] %vm33_vm5, %v32_v32   ;;  %vm129_vm5 = vcmask 392544  }
  0x81   :  { %40 = vst.msk [vmem:[#allocation0] sm:$0x1] %vm39_vm6, %v38_v33   ;;  %vm135_vm6 = vcmask 359744  }
  0x84   :  { %v44_v41 = vpop.permute.xlu0 %43   ;;  %v50_v42 = vpop.permute.xlu1 %49  }
  0x85   :  { %46 = vst.msk [vmem:[#allocation0] sm:$0x1] %vm45_vm7, %v44_v41   ;;  %v110_v43 = vpop.permute.xlu2 %109   ;;  %vm141_vm7 = vcmask 326944  }
  0x86   :  { %52 = vst.msk [vmem:[#allocation0] sm:$0x1] %vm51_vm8, %v50_v42   ;;  %vm147_vm8 = vcmask 294144  }
  0x87   :  { %58 = vst.msk [vmem:[#allocation0] sm:$0x1] %vm57_vm9, %v56_v34   ;;  %vm153_vm9 = vcmask 261344  }
  0x8c   :  { %v62_v44 = vpop.permute.xlu0 %61   ;;  %v68_v45 = vpop.permute.xlu1 %67  }
  0x8d   :  { %64 = vst.msk [vmem:[#allocation0] sm:$0x1] %vm63_vm10, %v62_v44   ;;  %v128_v46 = vpop.permute.xlu2 %127   ;;  %vm159_vm10 = vcmask 228544  }
  0x8e   :  { %70 = vst.msk [vmem:[#allocation0] sm:$0x1] %vm69_vm11, %v68_v45   ;;  %vm165_vm11 = vcmask 195744  }
  0x8f   :  { %76 = vst.msk [vmem:[#allocation0] sm:$0x1] %vm75_vm12, %v74_v37   ;;  %vm171_vm12 = vcmask 162944  }
  0x94   :  { %v80_v47 = vpop.permute.xlu0 %79   ;;  %v86_v48 = vpop.permute.xlu1 %85  }
  0x95   :  { %82 = vst.msk [vmem:[#allocation0] sm:$0x1] %vm81_vm13, %v80_v47   ;;  %v146_v49 = vpop.permute.xlu2 %145   ;;  %vm177_vm13 = vcmask 130144  }
  0x96   :  { %88 = vst.msk [vmem:[#allocation0] sm:$0x1] %vm87_vm14, %v86_v48   ;;  %vm183_vm14 = vcmask 97344  }
  0x97   :  { %94 = vst.msk [vmem:[#allocation0] sm:$0x1] %vm93_vm15, %v92_v40   ;;  %vm189_vm15 = vcmask 64544  }
  0x9c   :  { %v98_v50 = vpop.permute.xlu0 %97   ;;  %v104_v51 = vpop.permute.xlu1 %103  }
  0x9d   :  { %100 = vst.msk [vmem:[#allocation0] sm:$0x1] %vm99_vm0, %v98_v50   ;;  %v164_v52 = vpop.permute.xlu2 %163  }
  0x9e   :  { %106 = vst.msk [vmem:[#allocation0] sm:$0x1] %vm105_vm1, %v104_v51  }
  0x9f   :  { %112 = vst.msk [vmem:[#allocation0] sm:$0x1] %vm111_vm2, %v110_v43  }
  0xa4   :  { %v116_v53 = vpop.permute.xlu0 %115   ;;  %v122_v54 = vpop.permute.xlu1 %121  }
  0xa5   :  { %118 = vst.msk [vmem:[#allocation0] sm:$0x1] %vm117_vm3, %v116_v53   ;;  %v182_v55 = vpop.permute.xlu2 %181  }
  0xa6   :  { %124 = vst.msk [vmem:[#allocation0] sm:$0x1] %vm123_vm4, %v122_v54  }
  0xa7   :  { %130 = vst.msk [vmem:[#allocation0] sm:$0x1] %vm129_vm5, %v128_v46  }
  0xac   :  { %v134_v56 = vpop.permute.xlu0 %133   ;;  %v140_v57 = vpop.permute.xlu1 %139  }
  0xad   :  { %136 = vst.msk [vmem:[#allocation0] sm:$0x1] %vm135_vm6, %v134_v56  }
  0xae   :  { %142 = vst.msk [vmem:[#allocation0] sm:$0x1] %vm141_vm7, %v140_v57  }
  0xaf   :  { %148 = vst.msk [vmem:[#allocation0] sm:$0x1] %vm147_vm8, %v146_v49  }
  0xb4   :  { %v152_v58 = vpop.permute.xlu0 %151   ;;  %v158_v59 = vpop.permute.xlu1 %157  }
  0xb5   :  { %154 = vst.msk [vmem:[#allocation0] sm:$0x1] %vm153_vm9, %v152_v58  }
  0xb6   :  { %160 = vst.msk [vmem:[#allocation0] sm:$0x1] %vm159_vm10, %v158_v59  }
  0xb7   :  { %166 = vst.msk [vmem:[#allocation0] sm:$0x1] %vm165_vm11, %v164_v52  }
  0xbc   :  { %v170_v60 = vpop.permute.xlu0 %169   ;;  %v176_v61 = vpop.permute.xlu1 %175  }
  0xbd   :  { %172 = vst.msk [vmem:[#allocation0] sm:$0x1] %vm171_vm12, %v170_v60  }
  0xbe   :  { %178 = vst.msk [vmem:[#allocation0] sm:$0x1] %vm177_vm13, %v176_v61  }
  0xbf   :  { %184 = vst.msk [vmem:[#allocation0] sm:$0x1] %vm183_vm14, %v182_v55  }
  0xc4   :  { %v188_v62 = vpop.permute.xlu0 %187  }
  0xc5   :  { %190 = vst.msk [vmem:[#allocation0] sm:$0x1] %vm189_vm15, %v188_v62  }
  0xcc   :  { %v193_v63 = vld [vmem:[#allocation0] sm:$0x1] }
  0xcd   :  { %196 = vst [vmem:[%s400_s1] sm:$0x1] %v193_v63 }

// kernel: tile.43
= control target key start
LH: loop header
LB: loop body
LE: loop exit
PB: predicated region body
PF: predicated region fallthrough
CT: control target
= control target key end

     0   :  { %s28_s0 = inlined_call_operand.vmem [shape: f32[8], index: 0, kind: input, shape index: {}]   ;;  %s29_s1 = inlined_call_operand.vmem [shape: f32[16,8], index: 1, kind: output, shape index: {}]  }
   0x1   :  { %v4_v0 = vld [vmem:[%s28_s0] ss:$0 sm:$0xff] }
   0x2   :  { %5 = vst [vmem:[%s29_s1] sm:$0xff] %v4_v0 }
   0x3   :  { %8 = vst [vmem:[%s29_s1 + $0x8] sm:$0xff] %v4_v0 }

// kernel: tile.44
= control target key start
LH: loop header
LB: loop body
LE: loop exit
PB: predicated region body
PF: predicated region fallthrough
CT: control target
= control target key end

     0   :  { %s131_s10 = smov 120   ;;  %s132_s11 = smov 104   ;;  %vm3_vm0 = vcmask 64512   ;;  %vm9_vm1 = vcmask 1048512   ;;  %vm15_vm2 = vcmask 982912   ;;  %vm21_vm3 = vcmask 917312   ;;  %s207_s0 = inlined_call_operand.vmem [shape: f32[16,8], index: 0, kind: input, shape index: {}]   ;;  %s208_s1 = inlined_call_operand.vmem [shape: f32[1,128], index: 1, kind: output, shape index: {}]  }
   0x1   :  { %v101_v0 = vld [vmem:[%s207_s0 + $0xf] sm:$0x1]   ;;  %v103_v1 = vld [vmem:[%s207_s0 + $0xd] sm:$0x1]   ;;  %v105_v2 = vld [vmem:[%s207_s0 + $0xb] sm:$0x1]  }
   0x2   :  { %7 = vrot.lane.b32.xlu0 %v101_v0, %s131_s10  ;;  %19 = vrot.lane.b32.xlu1 %v103_v1, %s132_s11  ;;  %s133_s14 = smov 88   ;;  %v102_v3 = vld [vmem:[%s207_s0 + $0xe] sm:$0x1]   ;;  %v104_v4 = vld [vmem:[%s207_s0 + $0xc] sm:$0x1]   ;;  %s134_s19 = smov 112  }
   0x3   :  { %31 = vrot.lane.b32.xlu2 %v105_v2, %s133_s14  ;;  %s135_s20 = smov 96   ;;  %v106_v5 = vld [vmem:[%s207_s0 + $0xa] sm:$0x1]   ;;  %s136_s23 = smov 80   ;;  %v107_v6 = vld [vmem:[%s207_s0 + $0x9] sm:$0x1]  }
   0x4   :  { %v108_v7 = vld [vmem:[%s207_s0 + $0x8] sm:$0x1]   ;;  %s137_s28 = smov 72   ;;  %s138_s29 = smov 64   ;;  %v109_v8 = vld [vmem:[%s207_s0 + $0x7] sm:$0x1]  }
   0x5   :  { %s139_s3 = smov 56   ;;  %v110_v9 = vld [vmem:[%s207_s0 + $0x6] sm:$0x1]   ;;  %v111_v10 = vld [vmem:[%s207_s0 + $0x5] sm:$0x1]   ;;  %s140_s8 = smov 48  }
   0x6   :  { %s141_s9 = smov 40   ;;  %v112_v11 = vld [vmem:[%s207_s0 + $0x4] sm:$0x1]   ;;  %s142_s12 = smov 32   ;;  %v113_v12 = vld [vmem:[%s207_s0 + $0x3] sm:$0x1]  }
   0x7   :  { %v114_v13 = vld [vmem:[%s207_s0 + $0x2] sm:$0x1]   ;;  %s143_s17 = smov 24   ;;  %s144_s18 = smov 16   ;;  %v115_v14 = vld [vmem:[%s207_s0 + $0x1] sm:$0x1]  }
   0x8   :  { %s145_s21 = smov 8   ;;  %v2_v15 = vld [vmem:[%s207_s0] sm:$0x1]   ;;  %vm27_vm4 = vcmask 851712   ;;  %vm33_vm5 = vcmask 786112   ;;  %vm39_vm6 = vcmask 720512  }
   0x9   :  { %4 = vst.msk [vmem:[#allocation0] sm:$0x1] %vm3_vm0, %v2_v15   ;;  %vm45_vm7 = vcmask 654912   ;;  %vm51_vm8 = vcmask 589312   ;;  %vm57_vm9 = vcmask 523712   ;;  %vm63_vm10 = vcmask 458112  }
   0xa   :  { %13 = vrot.lane.b32.xlu0 %v102_v3, %s134_s19  ;;  %25 = vrot.lane.b32.xlu1 %v104_v4, %s135_s20  ;;  %vm69_vm11 = vcmask 392512   ;;  %vm75_vm12 = vcmask 326912   ;;  %vm81_vm13 = vcmask 261312   ;;  %vm87_vm14 = vcmask 195712  }
   0xb   :  { %37 = vrot.lane.b32.xlu2 %v106_v5, %s136_s23  ;;  %vm93_vm15 = vcmask 130112  }
  0x12   :  { %43 = vrot.lane.b32.xlu0 %v107_v6, %s137_s28  ;;  %49 = vrot.lane.b32.xlu1 %v108_v7, %s138_s29 }
  0x13   :  { %55 = vrot.lane.b32.xlu2 %v109_v8, %s139_s3 }
  0x1a   :  { %61 = vrot.lane.b32.xlu0 %v110_v9, %s140_s8  ;;  %67 = vrot.lane.b32.xlu1 %v111_v10, %s141_s9 }
  0x1b   :  { %73 = vrot.lane.b32.xlu2 %v112_v11, %s142_s12 }
  0x22   :  { %79 = vrot.lane.b32.xlu0 %v113_v12, %s143_s17  ;;  %85 = vrot.lane.b32.xlu1 %v114_v13, %s144_s18 }
  0x23   :  { %91 = vrot.lane.b32.xlu2 %v115_v14, %s145_s21 }
  0x5d   :  { %v32_v16 = vpop.permute.xlu2 %31  }
  0x65   :  { %v38_v17 = vpop.permute.xlu2 %37  }
  0x6d   :  { %v56_v18 = vpop.permute.xlu2 %55  }
  0x74   :  { %v8_v19 = vpop.permute.xlu0 %7   ;;  %v20_v20 = vpop.permute.xlu1 %19  }
  0x75   :  { %10 = vst.msk [vmem:[#allocation0] sm:$0x1] %vm9_vm1, %v8_v19   ;;  %v74_v21 = vpop.permute.xlu2 %73  }
  0x7c   :  { %v14_v22 = vpop.permute.xlu0 %13   ;;  %v26_v23 = vpop.permute.xlu1 %25  }
  0x7d   :  { %16 = vst.msk [vmem:[#allocation0] sm:$0x1] %vm15_vm2, %v14_v22   ;;  %v92_v24 = vpop.permute.xlu2 %91  }
  0x7e   :  { %22 = vst.msk [vmem:[#allocation0] sm:$0x1] %vm21_vm3, %v20_v20  }
  0x7f   :  { %28 = vst.msk [vmem:[#allocation0] sm:$0x1] %vm27_vm4, %v26_v23  }
  0x80   :  { %34 = vst.msk [vmem:[#allocation0] sm:$0x1] %vm33_vm5, %v32_v16  }
  0x81   :  { %40 = vst.msk [vmem:[#allocation0] sm:$0x1] %vm39_vm6, %v38_v17  }
  0x84   :  { %v44_v25 = vpop.permute.xlu0 %43   ;;  %v50_v26 = vpop.permute.xlu1 %49  }
  0x85   :  { %46 = vst.msk [vmem:[#allocation0] sm:$0x1] %vm45_vm7, %v44_v25  }
  0x86   :  { %52 = vst.msk [vmem:[#allocation0] sm:$0x1] %vm51_vm8, %v50_v26  }
  0x87   :  { %58 = vst.msk [vmem:[#allocation0] sm:$0x1] %vm57_vm9, %v56_v18  }
  0x8c   :  { %v62_v27 = vpop.permute.xlu0 %61   ;;  %v68_v28 = vpop.permute.xlu1 %67  }
  0x8d   :  { %64 = vst.msk [vmem:[#allocation0] sm:$0x1] %vm63_vm10, %v62_v27  }
  0x8e   :  { %70 = vst.msk [vmem:[#allocation0] sm:$0x1] %vm69_vm11, %v68_v28  }
  0x8f   :  { %76 = vst.msk [vmem:[#allocation0] sm:$0x1] %vm75_vm12, %v74_v21  }
  0x94   :  { %v80_v29 = vpop.permute.xlu0 %79   ;;  %v86_v30 = vpop.permute.xlu1 %85  }
  0x95   :  { %82 = vst.msk [vmem:[#allocation0] sm:$0x1] %vm81_vm13, %v80_v29  }
  0x96   :  { %88 = vst.msk [vmem:[#allocation0] sm:$0x1] %vm87_vm14, %v86_v30  }
  0x97   :  { %94 = vst.msk [vmem:[#allocation0] sm:$0x1] %vm93_vm15, %v92_v24  }
  0x9e   :  { %v97_v31 = vld [vmem:[#allocation0] sm:$0x1] }
  0x9f   :  { %100 = vst [vmem:[%s208_s1] sm:$0x1] %v97_v31 }

// kernel: tile.53
= control target key start
LH: loop header
LB: loop body
LE: loop exit
PB: predicated region body
PF: predicated region fallthrough
CT: control target
= control target key end

     0   :  { %s22_s0 = inlined_call_operand.vmem [shape: f32[16], index: 0, kind: input, shape index: {}]   ;;  %s23_s1 = inlined_call_operand.vmem [shape: f32[4,16], index: 1, kind: output, shape index: {}]  }
   0x1   :  { %v4_v0 = vld [vmem:[%s22_s0] ss:$0 sm:$0xff] }
   0x2   :  { %5 = vst [vmem:[%s23_s1] sm:$0xf] %v4_v0 }

// kernel: tile.54
= control target key start
LH: loop header
LB: loop body
LE: loop exit
PB: predicated region body
PF: predicated region fallthrough
CT: control target
= control target key end

     0   :  { %s37_s8 = smov 16   ;;  %s38_s9 = smov 32   ;;  %vm7_vm0 = vcmask 130048   ;;  %vm13_vm1 = vcmask 523648   ;;  %vm19_vm2 = vcmask 392448   ;;  %vm25_vm3 = vcmask 261248   ;;  %s55_s0 = inlined_call_operand.vmem [shape: f32[4,16], index: 0, kind: input, shape index: {}]   ;;  %s56_s1 = inlined_call_operand.vmem [shape: f32[1,64], index: 1, kind: output, shape index: {}]  }
   0x1   :  { %v4_v0 = vld [vmem:[%s55_s0] sm:$0xf]  ;;  %s36_s0 = smov 48  }
   0x2   :  { %5 = vst [vmem:[#allocation1] sm:$0xf] %v4_v0 }
   0x9   :  { %v10_v1 = vld [vmem:[#allocation1 + $0x3] sm:$0x1]   ;;  %v22_v2 = vld [vmem:[#allocation1 + $0x1] sm:$0x1]   ;;  %v16_v3 = vld [vmem:[#allocation1 + $0x2] sm:$0x1]  }
   0xa   :  { %11 = vrot.lane.b32.xlu0 %v10_v1, %s36_s0  ;;  %23 = vrot.lane.b32.xlu1 %v22_v2, %s37_s8  ;;  %v6_v4 = vld [vmem:[#allocation1] sm:$0x1]  }
   0xb   :  { %8 = vst.msk [vmem:[#allocation0] sm:$0x1] %vm7_vm0, %v6_v4  }
  0x12   :  { %17 = vrot.lane.b32.xlu0 %v16_v3, %s38_s9 }
  0x7c   :  { %v12_v5 = vpop.permute.xlu0 %11   ;;  %v24_v6 = vpop.permute.xlu1 %23  }
  0x7d   :  { %14 = vst.msk [vmem:[#allocation0] sm:$0x1] %vm13_vm1, %v12_v5  }
  0x84   :  { %v18_v7 = vpop.permute.xlu0 %17  }
  0x85   :  { %20 = vst.msk [vmem:[#allocation0] sm:$0x1] %vm19_vm2, %v18_v7  }
  0x86   :  { %26 = vst.msk [vmem:[#allocation0] sm:$0x1] %vm25_vm3, %v24_v6  }
  0x8d   :  { %v29_v8 = vld [vmem:[#allocation0] sm:$0x1] }
  0x8e   :  { %32 = vst [vmem:[%s56_s1] sm:$0x1] %v29_v8 }

// kernel: encoder_forward.1
= control target key start
LH: loop header
LB: loop body
LE: loop exit
PB: predicated region body
PF: predicated region fallthrough
CT: control target
= control target key end

     0   :  { %s2929_s0 = inlined_call_operand.vmem [shape: f32[2,32,32], index: 0, kind: input, shape index: {}]   ;;  %s2930_s1 = inlined_call_operand.vmem [shape: f32[3,32,128], index: 1, kind: input, shape index: {}]   ;;  %s2931_s2 = inlined_call_operand.vmem [shape: f32[1,128], index: 2, kind: input, shape index: {}]   ;;  %s2932_s3 = inlined_call_operand.vmem [shape: f32[1,128], index: 3, kind: input, shape index: {}]   ;;  %s2933_s4 = inlined_call_operand.vmem [shape: f32[2,128,64], index: 4, kind: input, shape index: {}]   ;;  %s2934_s5 = inlined_call_operand.vmem [shape: f32[2,16,32], index: 5, kind: input, shape index: {}]   ;;  %s2935_s6 = inlined_call_operand.vmem [shape: f32[3,64,128], index: 6, kind: input, shape index: {}]   ;;  %s2936_s7 = inlined_call_operand.vmem [shape: f32[1,128], index: 7, kind: input, shape index: {}]   ;;  %s2937_s8 = inlined_call_operand.vmem [shape: f32[1,128], index: 8, kind: input, shape index: {}]   ;;  %s2938_s9 = inlined_call_operand.vmem [shape: f32[4,128,32], index: 9, kind: input, shape index: {}]   ;;  %s2939_s10 = inlined_call_operand.vmem [shape: f32[4,4,16], index: 10, kind: input, shape index: {}]   ;;  %s2940_s11 = inlined_call_operand.vmem [shape: f32[3,32,64], index: 11, kind: input, shape index: {}]   ;;  %s2941_s12 = inlined_call_operand.vmem [shape: f32[1,64], index: 12, kind: input, shape index: {}]   ;;  %s2942_s13 = inlined_call_operand.vmem [shape: f32[1,64], index: 13, kind: input, shape index: {}]   ;;  %s2943_s14 = inlined_call_operand.vmem [shape: f32[4,64,16], index: 14, kind: input, shape index: {}]   ;;  %s2944_s15 = inlined_call_operand.vmem [shape: f32[4,1,4], index: 15, kind: input, shape index: {}]   ;;  %s2945_s16 = inlined_call_operand.vmem [shape: f32[16,16], index: 16, kind: input, shape index: {}]   ;;  %s2946_s17 = inlined_call_operand.vmem [shape: f32[16,16], index: 17, kind: input, shape index: {}]   ;;  %s2947_s18 = inlined_call_operand.vmem [shape: f32[1,16], index: 18, kind: input, shape index: {}]   ;;  %s2948_s19 = inlined_call_operand.vmem [shape: f32[16,8], index: 19, kind: input, shape index: {}]   ;;  %s2949_s20 = inlined_call_operand.vmem [shape: f32[1,8], index: 20, kind: input, shape index: {}]   ;;  %s2950_s21 = inlined_call_operand.hbm [shape: f32[2,1,8], index: 21, kind: output, shape index: {}]  }
   0x1   :  { %2963 = sst [smem:[#allocation12_spill]] %s2929_s0 }
   0x2   :  { %2964 = sst [smem:[#allocation13_spill]] %s2930_s1 }
   0x3   :  { %2965 = sst [smem:[#allocation14_spill]] %s2931_s2 }
   0x4   :  { %2966 = sst [smem:[#allocation15_spill]] %s2932_s3 }
   0x5   :  { %2967 = sst [smem:[#allocation16_spill]] %s2933_s4 }
   0x6   :  { %2968 = sst [smem:[#allocation17_spill]] %s2934_s5 }
   0x7   :  { %2969 = sst [smem:[#allocation18_spill]] %s2935_s6 }
   0x8   :  { %2970 = sst [smem:[#allocation19_spill]] %s2936_s7 }
   0x9   :  { %26 = vsyncpa [#allocation3], 0 }
   0xa   :  { %28 = vsyncpa [#allocation3 + $0x1], 0  ;;  %s2187_s15 = smov 0   ;;  %s2189_s2 = smov 0  }
   0xb   :  { %s2191_s25 = smov 0   ;;  %s2193_s26 = smov 0  }
   0xc LB: > { %2971 = sst [smem:[#allocation5_spill]] %s2063_s15  ;;  %s2208_s27 = sadd.s32 4294967295, %s2075_s26   ;;  %s2075_s26 = sphi %s2193_s26, %s2992_s26   ;;  %s2071_s25 = sphi %s2191_s25, %s2994_s25   ;;  %s2067_s2 = sphi %s2189_s2, %s2996_s2   ;;  %s2063_s15 = sphi %s2187_s15, %s2995_s15  }
   0xd   : > { %2972 = sst [smem:[#allocation6_spill]] %s2071_s25  ;;  %s1798_s3 = sadd.s32 4294967294, %s2075_s26  }
   0xe   : > { %2973 = sst [smem:[#allocation7_spill]] %s2075_s26  ;;  %s2212_s28 = sadd.s32 1, %s2075_s26  }
   0xf   : > { %2974 = sst [smem:[#allocation8_spill]] %s2212_s28  ;;  %s487_s29 = sadd.s32 1, %s2071_s25 }
  0x10   : > { %s484_s0 = ssub.s32 %s2075_s26, %s2212_s28  ;;  %p497_p0 = scmp.ne.s32.totalorder %s2071_s25, %s2067_s2 }
  0x11   : > { %p485_p1 = scmp.eq.s32.totalorder %s484_s0, 0  ;;  %p498_p2 = scmp.eq.s32.totalorder %s2208_s27, 1 }
  0x12   : > { %p503_p3 = scmp.ne.s32.totalorder %s2067_s2, %s2063_s15  ;;  %p504_p4 = scmp.eq.s32.totalorder %s1798_s3, 1 }
  0x13   : > { %s2223_s4 = scalar_select %p485_p1, %s2071_s25, %s487_s29  }
  0x14   : > { %p2225_p5 = por %p498_p2, %p497_p0  ;;  %p2229_p6 = por %p504_p4, %p503_p3 }
  0x15   : > { %2975 = sst [smem:[#allocation9_spill]] %s2223_s4  ;;  %p1801_p7 = scmp.ge.s32.totalorder %s2075_s26, 1 }
  0x16   : > { %s2976_s30 = scalar_select %p2225_p5, 1, 0 }
  0x17   : > { %s2978_s5 = scalar_select %p2229_p6, 1, 0 }
  0x18   : > { %2977 = sst [smem:[#allocation10_spill]] %s2976_s30  ;;  %p590_p8 = scmp.lt.s32.totalorder %s2075_s26, 3 }
  0x19   : > { %2979 = sst [smem:[#allocation11_spill]] %s2978_s5 }
  0x1a   : > { %p591_p9 = pnand %p1801_p7, %p590_p8 }
  0x1b   : > { %s2980_s1 = sld [smem:[#allocation13_spill]] (!%p591_p9)  ;;  %p649_p10 = scmp.lt.s32.totalorder (!%p591_p9), %s2208_s27, 1 }
  0x1c   : > { %594 = sbr.rel (%p591_p9) target bundleno = 1636 (0x664), region = 104  ;;  %s2981_s30 = sld [smem:[#allocation12_spill]] (!%p591_p9) }
  0x1d   : > { %s2982_s22 = sld [smem:[#allocation16_spill]] (!%p591_p9)  ;;  %s647_s23 = sand.u32 (!%p591_p9), 1, %s2067_s2  }
  0x1e   : > { %s2985_s28 = sld [smem:[#allocation17_spill]] (!%p591_p9)  ;;  %s1739_s3 = scalar_lea.hbm (!%p591_p9), %s2950_s21, %s2208_s27 }
  0x1f   : > { %s2986_s6 = sld [smem:[#allocation18_spill]] (!%p591_p9)  ;;  %s648_s4 = scalar_lea.vmem (!%p591_p9), [#allocation2], %s647_s23 }
  0x20   : > { %s2987_s7 = sld [smem:[#allocation19_spill]] (!%p591_p9)  ;;  %s1741_s5 = sshll.u32 (!%p591_p9), %s648_s4, 4  ;;  %s1742_s5 = int_to_ptr.vmem [resolvable:$true] %s1741_s5 }
  0x21   : > { %v1819_v0 = vld [vmem:[%s2980_s1 + $0x58] sm:$0xff]  ;;  %v1818_v1 = vld [vmem:[%s2980_s1 + $0x50] sm:$0xff]  ;;  %v1817_v5 = vld [vmem:[%s2980_s1 + $0x48] sm:$0xff]  ;;  %s650_s29 = scalar_select %p649_p10, %s2208_s27, 1  ;;  %vm662_vm0 = vcmask 1040384   ;;  %vm695_vm1 = vcmask 261120  }
  0x22   : > { %v1807_v2 = vld [vmem:[%s2980_s1 + $0x38] sm:$0xff]  ;;  %805 = vmatpush.msra.mxu2 %v1819_v0  ;;  %v1806_v4 = vld [vmem:[%s2980_s1 + $0x30] sm:$0xff]  ;;  %v1805_v7 = vld [vmem:[%s2980_s1 + $0x28] sm:$0xff]  ;;  %vm775_vm2 = vcmask 1045504   ;;  %vm685_vm3 = vcmask 1046528   ;;  %vm1039_vm4 = vcmask 523264  }
  0x23   : > { %716 = vmatpush.msra.mxu0 %v1807_v2  ;;  %v677_v3 = vld [vmem:[%s2980_s1 + $0x18] sm:$0xff]  ;;  %v676_v6 = vld [vmem:[%s2980_s1 + $0x10] sm:$0xff]  ;;  %v1816_v8 = vld [vmem:[%s2980_s1 + $0x40] sm:$0xff]  ;;  %s1967_s24 = sshll.u32 %s650_s29, 5  ;;  %vm1317_vm5 = vcmask 130048   ;;  %vm1423_vm6 = vcmask 1044480  }
  0x24   : > { %753 = vmatpush.msra.mxu1 %v677_v3  ;;  %806 = vmatpush.msra.mxu2 %v1818_v1  ;;  %v675_v9 = vld [vmem:[%s2980_s1 + $0x8] sm:$0xff]  ;;  %v1804_v10 = vld [vmem:[%s2980_s1 + $0x20] sm:$0xff]  ;;  %s2276_s25 = scalar_lea.vmem %s2981_s30, %s1967_s24  ;;  %v861_v12 = vld [vmem:[%s2982_s22 + $0x78] sm:$0xff]  ;;  %s2983_s24 = sld [smem:[#allocation14_spill]]  ;;  %vm1641_vm7 = vcmask 125952   ;;  %vm1728_vm8 = vcmask 57344  }
  0x25   : > { %717 = vmatpush.msra.mxu0 %v1806_v4  ;;  %v674_v11 = vld [vmem:[%s2980_s1] sm:$0xff]  ;;  %v1839_v13 = vld [vmem:[%s2982_s22 + $0xf8] sm:$0xff]  ;;  %v860_v14 = vld [vmem:[%s2982_s22 + $0x70] sm:$0xff]  ;;  %862 = vmatpush.msra.mxu3 %v861_v12  ;;  %s1743_s1 = sshll.u32 %s1739_s3, 4  ;;  %s1731_s29 = scalar_lea.sflag [#allocation3], %s647_s23  ;;  %s1744_s1 = int_to_ptr.hbm [resolvable:$true] %s1743_s1 }
  0x26   : > { %754 = vmatpush.msra.mxu1 %v676_v6  ;;  %807 = vmatpush.msra.mxu2 %v1817_v5  ;;  %v654_v15 = vld [vmem:[%s2276_s25] sm:$0xff]  ;;  %v655_v16 = vld [vmem:[%s2276_s25 + $0x8] sm:$0xff]  ;;  %v656_v17 = vld [vmem:[%s2276_s25 + $0x10] sm:$0xff]  ;;  %s2027_s26 = sshra.s32 %s1744_s1, 4  ;;  %s2028_s26 = int_to_ptr.hbm [resolvable:$true] %s2027_s26 }
  0x27   : > { %718 = vmatpush.msra.mxu0 %v1805_v7  ;;  %v663_v18 = vrot.slane %v654_v15, 7  ;;  %v664_v19 = vrot.slane %v655_v16, 7  ;;  %v666_v20 = vrot.slane %v656_v17, 7  ;;  %v1838_v21 = vld [vmem:[%s2982_s22 + $0xf0] sm:$0xff]  ;;  %v859_v22 = vld [vmem:[%s2982_s22 + $0x68] sm:$0xff]  ;;  %863 = vmatpush.msra.mxu3 %v860_v14  ;;  %v858_v31 = vld [vmem:[%s2982_s22 + $0x60] sm:$0xff]  ;;  %p2034_p0 = scmp.lt.s32.totalorder %s2028_s26, %s2950_s21 }
  0x28   : > { %755 = vmatpush.msra.mxu1 %v675_v9  ;;  %808 = vmatpush.msra.mxu2 %v1816_v8  ;;  %v1837_v26 = vld [vmem:[%s2982_s22 + $0xe8] sm:$0xff]  ;;  %v1836_v32 = vld [vmem:[%s2982_s22 + $0xe0] sm:$0xff]  ;;  %v657_v35 = vld [vmem:[%s2276_s25 + $0x18] sm:$0xff]  ;;  %s2984_s25 = sld [smem:[#allocation15_spill]] }
  0x29   : > { %719 = vmatpush.msra.mxu0 %v1804_v10  ;;  %v665_v23 = vsel %vm662_vm0, %v663_v18, %v664_v19  ;;  %v672_v24 = vsel %vm662_vm0, 0.0, %v663_v18  ;;  %v667_v25 = vsel %vm662_vm0, %v664_v19, %v666_v20  ;;  %864 = vmatpush.msra.mxu3 %v859_v22  ;;  %v857_v38 = vld [vmem:[%s2982_s22 + $0x58] sm:$0xff]  ;;  %v668_v40 = vrot.slane %v657_v35, 7  ;;  %v856_v41 = vld [vmem:[%s2982_s22 + $0x50] sm:$0xff]  ;;  %v855_v43 = vld [vmem:[%s2982_s22 + $0x48] sm:$0xff] }
  0x2a   : > { %756 = vmatpush.msra.mxu1 %v674_v11  ;;  %v776_v27 = vrot.slane %v672_v24, 2  ;;  %v777_v28 = vrot.slane %v665_v23, 2  ;;  %v686_v29 = vrot.slane %v672_v24, 1  ;;  %v687_v30 = vrot.slane %v665_v23, 1  ;;  %v1835_v39 = vld [vmem:[%s2982_s22 + $0xd8] sm:$0xff]  ;;  %v1834_v42 = vld [vmem:[%s2982_s22 + $0xd0] sm:$0xff] }
  0x2b   : > { %908 = vmatpush.msrb.mxu0 %v1839_v13  ;;  %1812 = vmatmul.msk.f32.vlgmr.msra.gmra.mxu1 %vm695_vm1, %v672_v24  ;;  %v779_v36 = vrot.slane %v667_v25, 2  ;;  %v689_v37 = vrot.slane %v667_v25, 1  ;;  %v669_v46 = vsel %vm662_vm0, %v666_v20, %v668_v40  ;;  %v1833_v47 = vld [vmem:[%s2982_s22 + $0xc8] sm:$0xff]  ;;  %v854_v48 = vld [vmem:[%s2982_s22 + $0x40] sm:$0xff]  ;;  %v853_v50 = vld [vmem:[%s2982_s22 + $0x38] sm:$0xff]  ;;  %v673_v58 = vsel %vm662_vm0, %v668_v40, 0.0 }
  0x2c   : > { %v778_v33 = vsel %vm775_vm2, %v776_v27, %v777_v28  ;;  %v688_v34 = vsel %vm685_vm3, %v686_v29, %v687_v30  ;;  %865 = vmatpush.msra.mxu3 %v858_v31  ;;  %v1832_v49 = vld [vmem:[%s2982_s22 + $0xc0] sm:$0xff]  ;;  %v781_v51 = vrot.slane %v669_v46, 2  ;;  %v691_v52 = vrot.slane %v669_v46, 1  ;;  %v1831_v53 = vld [vmem:[%s2982_s22 + $0xb8] sm:$0xff]  ;;  %v852_v54 = vld [vmem:[%s2982_s22 + $0x30] sm:$0xff] }
  0x2d   : > { %909 = vmatpush.msrb.mxu0 %v1838_v21  ;;  %1820 = vmatmul.msk.f32.vlgmr.msra.gmra.mxu2 %vm695_vm1, %v778_v33  ;;  %v780_v44 = vsel %vm775_vm2, %v777_v28, %v779_v36  ;;  %v690_v45 = vsel %vm685_vm3, %v687_v30, %v689_v37  ;;  %v1830_v55 = vld [vmem:[%s2982_s22 + $0xb0] sm:$0xff]  ;;  %v783_v59 = vrot.slane %v673_v58, 2  ;;  %v693_v60 = vrot.slane %v673_v58, 1  ;;  %v851_v63 = vld [vmem:[%s2982_s22 + $0x28] sm:$0xff]  ;;  %v850_v1 = vld [vmem:[%s2982_s22 + $0x20] sm:$0xff] }
  0x2e   : > { %1808 = vmatmul.msk.f32.vlgmr.msra.gmra.mxu0 %vm695_vm1, %v688_v34  ;;  %866 = vmatpush.msra.mxu3 %v857_v38  ;;  %v782_v56 = vsel %vm775_vm2, %v779_v36, %v781_v51  ;;  %v692_v57 = vsel %vm685_vm3, %v689_v37, %v691_v52  ;;  %v1829_v0 = vld [vmem:[%s2982_s22 + $0xa8] sm:$0xff]  ;;  %v1828_v2 = vld [vmem:[%s2982_s22 + $0xa0] sm:$0xff]  ;;  %v849_v3 = vld [vmem:[%s2982_s22 + $0x18] sm:$0xff] }
  0x2f   : > { %910 = vmatpush.msrb.mxu0 %v1837_v26  ;;  %v784_v61 = vsel %vm775_vm2, %v781_v51, %v783_v59  ;;  %v694_v62 = vsel %vm685_vm3, %v691_v52, %v693_v60  ;;  %v1827_v4 = vld [vmem:[%s2982_s22 + $0x98] sm:$0xff]  ;;  %v848_v5 = vld [vmem:[%s2982_s22 + $0x10] sm:$0xff]  ;;  %v847_v7 = vld [vmem:[%s2982_s22 + $0x8] sm:$0xff] }
  0x30   : > { %867 = vmatpush.msra.mxu3 %v856_v41  ;;  %v1826_v6 = vld [vmem:[%s2982_s22 + $0x90] sm:$0xff]  ;;  %v1825_v8 = vld [vmem:[%s2982_s22 + $0x88] sm:$0xff]  ;;  %v846_v9 = vld [vmem:[%s2982_s22] sm:$0xff] }
  0x31   : > { %911 = vmatpush.msrb.mxu0 %v1836_v32  ;;  %v1824_v10 = vld [vmem:[%s2982_s22 + $0x80] sm:$0xff]  ;;  %v1022_v59 = vld [vmem:[%s2986_s6 + $0x38] sm:$0xff]  ;;  %v1021_v60 = vld [vmem:[%s2986_s6 + $0x30] sm:$0xff] }
  0x32   : > { %868 = vmatpush.msra.mxu3 %v855_v43  ;;  %v2007_v14 = vld [vmem:[%s2983_s24] ss:$0 sm:$0xff]  ;;  %s2033_s24 = scalar_lea.hbm %s2950_s21, 2 }
  0x33   : > { %912 = vmatpush.msrb.mxu0 %v1835_v39  ;;  %1813 = vmatmul.msk.f32.gmra.mxu1 %vm695_vm1, %v665_v23  ;;  %v2008_v18 = vld [vmem:[%s2984_s25] ss:$0 sm:$0xff] }
  0x34   : > { %869 = vmatpush.msra.mxu3 %v854_v48  ;;  %v941_v58 = vld [vmem:[%s2985_s28] sm:$0xff] }
  0x35   : > { %913 = vmatpush.msrb.mxu0 %v1834_v42  ;;  %1821 = vmatmul.msk.f32.gmra.mxu2 %vm695_vm1, %v780_v44 }
  0x36   : > { %1809 = vmatmul.msk.f32.gmra.mxu0 %vm695_vm1, %v690_v45  ;;  %870 = vmatpush.msra.mxu3 %v853_v50 }
  0x37   : > { %914 = vmatpush.msrb.mxu0 %v1833_v47 }
  0x38   : > { %871 = vmatpush.msra.mxu3 %v852_v54 }
  0x39   : > { %915 = vmatpush.msrb.mxu0 %v1832_v49 }
  0x3a   : > { %872 = vmatpush.msra.mxu3 %v851_v63  ;;  %v942_v63 = vld [vmem:[%s2985_s28 + $0x8] sm:$0xff] }
  0x3b   : > { %1814 = vmatmul.msk.f32.gmra.mxu1 %vm695_vm1, %v667_v25  ;;  %916 = vmatpush.msrb.mxu0 %v1831_v53 }
  0x3c   : > { %873 = vmatpush.msra.mxu3 %v850_v1  ;;  %v1018_v1 = vld [vmem:[%s2986_s6 + $0x18] sm:$0xff] }
  0x3d   : > { %917 = vmatpush.msrb.mxu0 %v1830_v55  ;;  %1822 = vmatmul.msk.f32.gmra.mxu2 %vm695_vm1, %v782_v56 }
  0x3e   : > { %1810 = vmatmul.msk.f32.gmra.mxu0 %vm695_vm1, %v692_v57  ;;  %874 = vmatpush.msra.mxu3 %v849_v3  ;;  %v1842_v57 = vld [vmem:[%s2985_s28 + $0x10] sm:$0xff]  ;;  %v1853_v3 = vld [vmem:[%s2986_s6 + $0x78] sm:$0xff] }
  0x3f   : > { %918 = vmatpush.msrb.mxu0 %v1829_v0  ;;  %v1019_v0 = vld [vmem:[%s2986_s6 + $0x20] sm:$0xff] }
  0x40   : > { %875 = vmatpush.msra.mxu3 %v848_v5  ;;  %v1016_v5 = vld [vmem:[%s2986_s6 + $0x8] sm:$0xff] }
  0x41   : > { %919 = vmatpush.msrb.mxu0 %v1828_v2  ;;  %v1017_v2 = vld [vmem:[%s2986_s6 + $0x10] sm:$0xff] }
  0x42   : > { %876 = vmatpush.msra.mxu3 %v847_v7  ;;  %v1864_v7 = vld [vmem:[%s2986_s6 + $0xb0] sm:$0xff] }
  0x43   : > { %1815 = vmatmul.msk.f32.gmra.mxu1 %vm695_vm1, %v669_v46  ;;  %920 = vmatpush.msrb.mxu0 %v1827_v4  ;;  %v1865_v4 = vld [vmem:[%s2986_s6 + $0xb8] sm:$0xff] }
  0x44   : > { %877 = vmatpush.msra.mxu3 %v846_v9  ;;  %v1851_v9 = vld [vmem:[%s2986_s6 + $0x68] sm:$0xff] }
  0x45   : > { %1823 = vmatmul.msk.f32.gmra.mxu2 %vm695_vm1, %v784_v61  ;;  %921 = vmatpush.msrb.mxu0 %v1826_v6  ;;  %v1020_v61 = vld [vmem:[%s2986_s6 + $0x28] sm:$0xff]  ;;  %v1852_v6 = vld [vmem:[%s2986_s6 + $0x70] sm:$0xff] }
  0x46   : > { %1811 = vmatmul.msk.f32.gmra.mxu0 %vm695_vm1, %v694_v62  ;;  %v1843_v62 = vld [vmem:[%s2985_s28 + $0x18] sm:$0xff]  ;;  %1120 = vmatpush.msrb.mxu3 %v1865_v4 }
  0x47   : > { %922 = vmatpush.msrb.mxu0 %v1825_v8  ;;  %v1015_v8 = vld [vmem:[%s2986_s6] sm:$0xff] }
  0x48   : > { %1121 = vmatpush.msrb.mxu3 %v1864_v7 }
  0x49   : > { %923 = vmatpush.msrb.mxu0 %v1824_v10  ;;  %v1863_v10 = vld [vmem:[%s2986_s6 + $0xa8] sm:$0xff] }
  0x4a   : > { %1122 = vmatpush.msrb.mxu3 %v1863_v10  ;;  %v1158_v10 = vld [vmem:[%s2938_s9 + $0x38] sm:$0xff] }
  0xa8   : > { %v758_v11 = vpop.f32.mrf.mxu1 }
  0xab   : > { %v721_v12 = vpop.f32.mrf.mxu0 }
  0xac   : > { %v759_v13 = vadd.f32 %v758_v11, %v721_v12  ;;  %v1850_v11 = vld [vmem:[%s2986_s6 + $0x60] sm:$0xff] }
  0xad   : > { %v1862_v12 = vld [vmem:[%s2986_s6 + $0xa0] sm:$0xff] }
  0xae   : > { %1123 = vmatpush.msrb.mxu3 %v1862_v12  ;;  %v1891_v12 = vld [vmem:[%s2938_s9 + $0x138] sm:$0xff] }
  0xb0   : > { %v761_v15 = vpop.f32.mrf.mxu1  ;;  %v810_v16 = vpop.f32.mrf.mxu2 }
  0xb1   : > { %v822_v17 = vadd.f32 %v810_v16, %v759_v13  ;;  %v1849_v13 = vld [vmem:[%s2986_s6 + $0x58] sm:$0xff]  ;;  %v1860_v16 = vld [vmem:[%s2986_s6 + $0x90] sm:$0xff] }
  0xb3   : > { %v724_v19 = vpop.f32.mrf.mxu0  ;;  %v830_v20 = vmul.f32 %v2007_v14, %v822_v17  ;;  %v1847_v17 = vld [vmem:[%s2986_s6 + $0x48] sm:$0xff] }
  0xb4   : > { %v762_v21 = vadd.f32 %v761_v15, %v724_v19  ;;  %v1848_v15 = vld [vmem:[%s2986_s6 + $0x50] sm:$0xff]  ;;  %v1846_v19 = vld [vmem:[%s2986_s6 + $0x40] sm:$0xff] }
  0xb5   : > { %v838_v22 = vadd.f32 %v2008_v18, %v830_v20  ;;  %v1858_v20 = vld [vmem:[%s2986_s6 + $0x80] sm:$0xff] }
  0xb7   : > { %v842_v23 = vmax.f32 %v838_v22, 0.0  ;;  %v1883_v22 = vld [vmem:[%s2938_s9 + $0xf8] sm:$0xff] }
  0xb8   : > { %v813_v24 = vpop.f32.mrf.mxu2  ;;  %v764_v25 = vpop.f32.mrf.mxu1 }
  0xb9   : > { %v823_v26 = vadd.f32 %v813_v24, %v762_v21  ;;  %878 = vmatmul.f32.vlgmr.msra.gmra.mxu3 %v842_v23  ;;  %924 = vmatmul.f32.vlgmr.msrb.gmra.mxu0 %v842_v23  ;;  %v1166_v21 = vld [vmem:[%s2938_s9 + $0x78] sm:$0xff] }
  0xba   : > { %v1899_v23 = vld [vmem:[%s2938_s9 + $0x178] sm:$0xff]  ;;  %1167 = vmatpush.msra.mxu0 %v1166_v21  ;;  %v1905_v21 = vld [vmem:[%s2938_s9 + $0x1a8] sm:$0xff] }
  0xbb   : > { %v727_v27 = vpop.f32.mrf.mxu0  ;;  %v831_v28 = vmul.f32 %v2007_v14, %v823_v26  ;;  %v1915_v24 = vld [vmem:[%s2938_s9 + $0x1f8] sm:$0xff]  ;;  %v1882_v26 = vld [vmem:[%s2938_s9 + $0xf0] sm:$0xff] }
  0xbc   : > { %v765_v29 = vadd.f32 %v764_v25, %v727_v27  ;;  %v1165_v25 = vld [vmem:[%s2938_s9 + $0x70] sm:$0xff] }
  0xbd   : > { %v839_v30 = vadd.f32 %v2008_v18, %v831_v28  ;;  %v1898_v27 = vld [vmem:[%s2938_s9 + $0x170] sm:$0xff]  ;;  %1168 = vmatpush.msra.mxu0 %v1165_v25  ;;  %v1904_v25 = vld [vmem:[%s2938_s9 + $0x1a0] sm:$0xff] }
  0xbe   : > { %v1914_v28 = vld [vmem:[%s2938_s9 + $0x1f0] sm:$0xff] }
  0xbf   : > { %v843_v31 = vmax.f32 %v839_v30, 0.0 }
  0xc0   : > { %v816_v32 = vpop.f32.mrf.mxu2  ;;  %v767_v35 = vpop.f32.mrf.mxu1 }
  0xc1   : > { %v824_v33 = vadd.f32 %v816_v32, %v765_v29  ;;  %881 = vmatmul.f32.gmra.mxu3 %v843_v31  ;;  %927 = vmatmul.f32.gmra.mxu0 %v843_v31  ;;  %v1164_v29 = vld [vmem:[%s2938_s9 + $0x68] sm:$0xff] }
  0xc2   : > { %v1881_v31 = vld [vmem:[%s2938_s9 + $0xe8] sm:$0xff]  ;;  %1169 = vmatpush.msra.mxu0 %v1164_v29  ;;  %v1903_v29 = vld [vmem:[%s2938_s9 + $0x198] sm:$0xff] }
  0xc3   : > { %v730_v34 = vpop.f32.mrf.mxu0  ;;  %v832_v36 = vmul.f32 %v2007_v14, %v824_v33  ;;  %v1897_v32 = vld [vmem:[%s2938_s9 + $0x168] sm:$0xff] }
  0xc4   : > { %v768_v37 = vadd.f32 %v767_v35, %v730_v34  ;;  %v1913_v33 = vld [vmem:[%s2938_s9 + $0x1e8] sm:$0xff]  ;;  %v1163_v34 = vld [vmem:[%s2938_s9 + $0x60] sm:$0xff] }
  0xc5   : > { %v840_v38 = vadd.f32 %v2008_v18, %v832_v36  ;;  %v1880_v35 = vld [vmem:[%s2938_s9 + $0xe0] sm:$0xff]  ;;  %1170 = vmatpush.msra.mxu0 %v1163_v34  ;;  %v1152_v34 = vld [vmem:[%s2938_s9 + $0x8] sm:$0xff] }
  0xc6   : > { %v1896_v36 = vld [vmem:[%s2938_s9 + $0x160] sm:$0xff] }
  0xc7   : > { %v844_v39 = vmax.f32 %v840_v38, 0.0  ;;  %v1162_v38 = vld [vmem:[%s2938_s9 + $0x58] sm:$0xff] }
  0xc8   : > { %v819_v40 = vpop.f32.mrf.mxu2  ;;  %1171 = vmatpush.msra.mxu0 %v1162_v38  ;;  %v1151_v38 = vld [vmem:[%s2938_s9] sm:$0xff] }
  0xc9   : > { %v825_v41 = vadd.f32 %v819_v40, %v768_v37  ;;  %884 = vmatmul.f32.gmra.mxu3 %v844_v39  ;;  %930 = vmatmul.f32.gmra.mxu0 %v844_v39  ;;  %v1912_v37 = vld [vmem:[%s2938_s9 + $0x1e0] sm:$0xff]  ;;  %v1879_v39 = vld [vmem:[%s2938_s9 + $0xd8] sm:$0xff] }
  0xcb   : > { %v833_v42 = vmul.f32 %v2007_v14, %v825_v41  ;;  %v1861_v14 = vld [vmem:[%s2986_s6 + $0x98] sm:$0xff] }
  0xcc   : > { %1124 = vmatpush.msrb.mxu3 %v1861_v14  ;;  %v1895_v41 = vld [vmem:[%s2938_s9 + $0x158] sm:$0xff]  ;;  %v1157_v14 = vld [vmem:[%s2938_s9 + $0x30] sm:$0xff] }
  0xcd   : > { %v841_v43 = vadd.f32 %v2008_v18, %v833_v42  ;;  %v1859_v18 = vld [vmem:[%s2986_s6 + $0x88] sm:$0xff]  ;;  %v1911_v42 = vld [vmem:[%s2938_s9 + $0x1d8] sm:$0xff]  ;;  %s2029_s6 = scalar_lea.hbm %s2028_s26, 1 }
  0xce   : > { %1125 = vmatpush.msrb.mxu3 %v1860_v16  ;;  %v1890_v16 = vld [vmem:[%s2938_s9 + $0x130] sm:$0xff]  ;;  %p2030_p11 = scmp.ne.s32.totalorder %s2028_s26, %s2029_s6  ;;  %p2035_p1 = scmp.lt.s32.totalorder %s2033_s24, %s2029_s6 }
  0xcf   : > { %v845_v44 = vmax.f32 %v841_v43, 0.0 }
  0xd0   : > { %1126 = vmatpush.msrb.mxu3 %v1859_v18  ;;  %v1156_v18 = vld [vmem:[%s2938_s9 + $0x28] sm:$0xff]  ;;  %p2031_p12 = pnand %p2030_p11, %p2225_p5  ;;  %p2036_p2 = por %p2035_p1, %p2034_p0 }
  0xd1   : > { %887 = vmatmul.f32.gmra.mxu3 %v845_v44  ;;  %933 = vmatmul.f32.gmra.mxu0 %v845_v44  ;;  %v1161_v44 = vld [vmem:[%s2938_s9 + $0x50] sm:$0xff] }
  0xd2   : > { %1127 = vmatpush.msrb.mxu3 %v1858_v20  ;;  %1172 = vmatpush.msra.mxu0 %v1161_v44  ;;  %v1889_v20 = vld [vmem:[%s2938_s9 + $0x128] sm:$0xff]  ;;  %p2032_p13 = pneg %p2031_p12 }
  0xd4   : > { %1291 = vmatpush.msra.mxu3 %v1915_v24  ;;  %v1888_v24 = vld [vmem:[%s2938_s9 + $0x120] sm:$0xff]  ;;  %p2037_p3 = pnand %p2036_p2, %p2032_p13 }
  0xd6   : > { %1292 = vmatpush.msra.mxu3 %v1914_v28  ;;  %v1887_v28 = vld [vmem:[%s2938_s9 + $0x118] sm:$0xff] }
  0xd8   : > { %1293 = vmatpush.msra.mxu3 %v1913_v33  ;;  %v1902_v33 = vld [vmem:[%s2938_s9 + $0x190] sm:$0xff] }
  0xda   : > { %1294 = vmatpush.msra.mxu3 %v1912_v37  ;;  %v1901_v37 = vld [vmem:[%s2938_s9 + $0x188] sm:$0xff] }
  0xdc   : > { %1295 = vmatpush.msra.mxu3 %v1911_v42 }
 0x136   : > { %v925_v45 = vpop.f32.mrf.mxu0 }
 0x13c   : > { %v879_v46 = vpop.f32.mrf.mxu3 }
 0x13d   : > { %v937_v56 = vmax.f32 %v879_v46, %v925_v45  ;;  %v1878_v45 = vld [vmem:[%s2938_s9 + $0xd0] sm:$0xff] }
 0x13e   : > { %v928_v47 = vpop.f32.mrf.mxu0  ;;  %v1894_v46 = vld [vmem:[%s2938_s9 + $0x150] sm:$0xff] }
 0x144   : > { %v882_v48 = vpop.f32.mrf.mxu3 }
 0x145   : > { %v938_v55 = vmax.f32 %v882_v48, %v928_v47  ;;  %v1910_v47 = vld [vmem:[%s2938_s9 + $0x1d0] sm:$0xff] }
 0x146   : > { %v931_v49 = vpop.f32.mrf.mxu0  ;;  %1296 = vmatpush.msra.mxu3 %v1910_v47 }
 0x14c   : > { %v885_v50 = vpop.f32.mrf.mxu3 }
 0x14d   : > { %v939_v54 = vmax.f32 %v885_v50, %v931_v49  ;;  %v1160_v49 = vld [vmem:[%s2938_s9 + $0x48] sm:$0xff] }
 0x14e   : > { %v934_v51 = vpop.f32.mrf.mxu0  ;;  %v1877_v50 = vld [vmem:[%s2938_s9 + $0xc8] sm:$0xff]  ;;  %1173 = vmatpush.msra.mxu0 %v1160_v49 }
 0x154   : > { %v888_v52 = vpop.f32.mrf.mxu3 }
 0x155   : > { %v940_v53 = vmax.f32 %v888_v52, %v934_v51  ;;  %v1893_v51 = vld [vmem:[%s2938_s9 + $0x148] sm:$0xff] }
 0x157   : > { %961 = vmatpush.msrb.mxu1 %v940_v53  ;;  %993 = vmatpush.msrb.mxu2 %v940_v53  ;;  %v1909_v53 = vld [vmem:[%s2938_s9 + $0x1c8] sm:$0xff] }
 0x158   : > { %1297 = vmatpush.msra.mxu3 %v1909_v53 }
 0x159   : > { %962 = vmatpush.msrb.mxu1 %v939_v54  ;;  %994 = vmatpush.msrb.mxu2 %v939_v54  ;;  %v1159_v54 = vld [vmem:[%s2938_s9 + $0x40] sm:$0xff] }
 0x15a   : > { %1174 = vmatpush.msra.mxu0 %v1159_v54 }
 0x15b   : > { %963 = vmatpush.msrb.mxu1 %v938_v55  ;;  %995 = vmatpush.msrb.mxu2 %v938_v55 }
 0x15c   : > { %1175 = vmatpush.msra.mxu0 %v1158_v10  ;;  %v1316_v10 = vld [vmem:[%s2939_s10] sm:$0xf] }
 0x15d   : > { %964 = vmatpush.msrb.mxu1 %v937_v56  ;;  %996 = vmatpush.msrb.mxu2 %v937_v56  ;;  %v1876_v56 = vld [vmem:[%s2938_s9 + $0xc0] sm:$0xff] }
 0x15e   : > { %1844 = vmatmul.msk.f32.vlgmr.msrb.gmra.mxu2 %vm695_vm1, %v1842_v57  ;;  %1840 = vmatmul.msk.f32.vlgmr.msrb.gmra.mxu1 %vm695_vm1, %v941_v58  ;;  %v1892_v57 = vld [vmem:[%s2938_s9 + $0x140] sm:$0xff] }
 0x15f   : > { %1079 = vmatpush.msra.mxu2 %v1022_v59  ;;  %1052 = vmatpush.msra.mxu1 %v1853_v3  ;;  %v1908_v58 = vld [vmem:[%s2938_s9 + $0x1c0] sm:$0xff] }
 0x160   : > { %1298 = vmatpush.msra.mxu3 %v1908_v58  ;;  %1176 = vmatpush.msra.mxu0 %v1157_v14  ;;  %v1428_v14 = vld [vmem:[%s2940_s11 + $0x18] sm:$0xff] }
 0x161   : > { %1080 = vmatpush.msra.mxu2 %v1021_v60  ;;  %1053 = vmatpush.msra.mxu1 %v1852_v6 }
 0x162   : > { %1177 = vmatpush.msra.mxu0 %v1156_v18  ;;  %v1925_v18 = vld [vmem:[%s2940_s11 + $0x30] sm:$0xff] }
 0x163   : > { %1081 = vmatpush.msra.mxu2 %v1020_v61  ;;  %1054 = vmatpush.msra.mxu1 %v1851_v9 }
 0x165   : > { %1082 = vmatpush.msra.mxu2 %v1019_v0  ;;  %1055 = vmatpush.msra.mxu1 %v1850_v11  ;;  %v1875_v11 = vld [vmem:[%s2938_s9 + $0xb8] sm:$0xff] }
 0x166   : > { %1845 = vmatmul.msk.f32.gmra.mxu2 %vm695_vm1, %v1843_v62  ;;  %1841 = vmatmul.msk.f32.gmra.mxu1 %vm695_vm1, %v942_v63 }
 0x167   : > { %1083 = vmatpush.msra.mxu2 %v1018_v1  ;;  %1056 = vmatpush.msra.mxu1 %v1849_v13  ;;  %v1907_v13 = vld [vmem:[%s2938_s9 + $0x1b8] sm:$0xff] }
 0x168   : > { %1299 = vmatpush.msra.mxu3 %v1907_v13  ;;  %v1919_v13 = vld [vmem:[%s2939_s10 + $0x8] sm:$0xf] }
 0x169   : > { %1084 = vmatpush.msra.mxu2 %v1017_v2  ;;  %1057 = vmatpush.msra.mxu1 %v1848_v15  ;;  %v1874_v15 = vld [vmem:[%s2938_s9 + $0xb0] sm:$0xff] }
 0x16b   : > { %1085 = vmatpush.msra.mxu2 %v1016_v5  ;;  %1058 = vmatpush.msra.mxu1 %v1847_v17  ;;  %v1906_v17 = vld [vmem:[%s2938_s9 + $0x1b0] sm:$0xff] }
 0x16c   : > { %1300 = vmatpush.msra.mxu3 %v1906_v17  ;;  %v1932_v17 = vld [vmem:[%s2940_s11 + $0x58] sm:$0xff] }
 0x16d   : > { %1086 = vmatpush.msra.mxu2 %v1015_v8  ;;  %1059 = vmatpush.msra.mxu1 %v1846_v19  ;;  %v1873_v19 = vld [vmem:[%s2938_s9 + $0xa8] sm:$0xff] }
 0x16e   : > { %1301 = vmatpush.msra.mxu3 %v1905_v21  ;;  %v1924_v21 = vld [vmem:[%s2940_s11 + $0x28] sm:$0xff] }
 0x16f   : > { %1207 = vmatpush.msrb.mxu1 %v1883_v22  ;;  %1249 = vmatpush.msrb.mxu2 %v1899_v23  ;;  %v1155_v22 = vld [vmem:[%s2938_s9 + $0x20] sm:$0xff] }
 0x170   : > { %v1872_v23 = vld [vmem:[%s2938_s9 + $0xa0] sm:$0xff]  ;;  %1178 = vmatpush.msra.mxu0 %v1155_v22  ;;  %1302 = vmatpush.msra.mxu3 %v1904_v25 }
 0x171   : > { %1208 = vmatpush.msrb.mxu1 %v1882_v26  ;;  %1250 = vmatpush.msrb.mxu2 %v1898_v27  ;;  %v1154_v26 = vld [vmem:[%s2938_s9 + $0x18] sm:$0xff]  ;;  %v1425_v22 = vld [vmem:[%s2940_s11] sm:$0xff] }
 0x172   : > { %v1871_v27 = vld [vmem:[%s2938_s9 + $0x98] sm:$0xff]  ;;  %1179 = vmatpush.msra.mxu0 %v1154_v26  ;;  %1303 = vmatpush.msra.mxu3 %v1903_v29  ;;  %v1929_v25 = vld [vmem:[%s2940_s11 + $0x40] sm:$0xff]  ;;  %v1941_v29 = vld [vmem:[%s2943_s14 + $0x70] sm:$0xff] }
 0x173   : > { %1209 = vmatpush.msrb.mxu1 %v1881_v31  ;;  %1251 = vmatpush.msrb.mxu2 %v1897_v32  ;;  %v1870_v31 = vld [vmem:[%s2938_s9 + $0x90] sm:$0xff]  ;;  %v1527_v26 = vld [vmem:[%s2943_s14 + $0x38] sm:$0xff] }
 0x174   : > { %v1886_v32 = vld [vmem:[%s2938_s9 + $0x110] sm:$0xff]  ;;  %1304 = vmatpush.msra.mxu3 %v1902_v33 }
 0x175   : > { %1210 = vmatpush.msrb.mxu1 %v1880_v35  ;;  %1252 = vmatpush.msrb.mxu2 %v1896_v36  ;;  %v1869_v35 = vld [vmem:[%s2938_s9 + $0x88] sm:$0xff] }
 0x176   : > { %v1885_v36 = vld [vmem:[%s2938_s9 + $0x108] sm:$0xff]  ;;  %1305 = vmatpush.msra.mxu3 %v1901_v37 }
 0x177   : > { %1211 = vmatpush.msrb.mxu1 %v1879_v39  ;;  %1253 = vmatpush.msrb.mxu2 %v1895_v41  ;;  %v1868_v39 = vld [vmem:[%s2938_s9 + $0x80] sm:$0xff] }
 0x178   : > { %v1900_v41 = vld [vmem:[%s2938_s9 + $0x180] sm:$0xff] }
 0x179   : > { %1212 = vmatpush.msrb.mxu1 %v1878_v45  ;;  %1254 = vmatpush.msrb.mxu2 %v1894_v46  ;;  %v2009_v45 = vld [vmem:[%s2987_s7] ss:$0 sm:$0xff] }
 0x17a   : > { %1306 = vmatpush.msra.mxu3 %v1900_v41 }
 0x17b   : > { %1213 = vmatpush.msrb.mxu1 %v1877_v50  ;;  %1255 = vmatpush.msrb.mxu2 %v1893_v51 }
 0x17d   : > { %1214 = vmatpush.msrb.mxu1 %v1876_v56  ;;  %1256 = vmatpush.msrb.mxu2 %v1892_v57 }
 0x17f   : > { %1215 = vmatpush.msrb.mxu1 %v1875_v11  ;;  %1257 = vmatpush.msrb.mxu2 %v1891_v12  ;;  %v1921_v11 = vld [vmem:[%s2939_s10 + $0xc] sm:$0xf]  ;;  %v1917_v12 = vld [vmem:[%s2939_s10 + $0x4] sm:$0xf] }
 0x181   : > { %1216 = vmatpush.msrb.mxu1 %v1874_v15  ;;  %1258 = vmatpush.msrb.mxu2 %v1890_v16  ;;  %v1926_v15 = vld [vmem:[%s2940_s11 + $0x38] sm:$0xff]  ;;  %v1427_v16 = vld [vmem:[%s2940_s11 + $0x10] sm:$0xff] }
 0x183   : > { %1217 = vmatpush.msrb.mxu1 %v1873_v19  ;;  %1259 = vmatpush.msrb.mxu2 %v1889_v20  ;;  %v1426_v19 = vld [vmem:[%s2940_s11 + $0x8] sm:$0xff]  ;;  %v1931_v20 = vld [vmem:[%s2940_s11 + $0x50] sm:$0xff] }
 0x185   : > { %1218 = vmatpush.msrb.mxu1 %v1872_v23  ;;  %1260 = vmatpush.msrb.mxu2 %v1888_v24  ;;  %v1930_v23 = vld [vmem:[%s2940_s11 + $0x48] sm:$0xff]  ;;  %v1923_v24 = vld [vmem:[%s2940_s11 + $0x20] sm:$0xff] }
 0x187   : > { %1219 = vmatpush.msrb.mxu1 %v1871_v27  ;;  %1261 = vmatpush.msrb.mxu2 %v1887_v28  ;;  %v1942_v27 = vld [vmem:[%s2943_s14 + $0x78] sm:$0xff]  ;;  %v1526_v28 = vld [vmem:[%s2943_s14 + $0x30] sm:$0xff] }
 0x189   : > { %1220 = vmatpush.msrb.mxu1 %v1870_v31  ;;  %1262 = vmatpush.msrb.mxu2 %v1886_v32  ;;  %v1960_v31 = vld [vmem:[%s2943_s14 + $0xf8] sm:$0xff] }
 0x18b   : > { %1221 = vmatpush.msrb.mxu1 %v1869_v35  ;;  %1263 = vmatpush.msrb.mxu2 %v1885_v36 }
 0x18d   : > { %1222 = vmatpush.msrb.mxu1 %v1868_v39 }
 0x1db   : > { %v966_v30 = vpop.f32.mrf.mxu1 }
 0x1e1   : > { %v998_v40 = vpop.f32.mrf.mxu2 }
 0x1e2   : > { %v1004_v43 = vmax.f32 %v966_v30, %v998_v40  ;;  %v1153_v30 = vld [vmem:[%s2938_s9 + $0x10] sm:$0xff]  ;;  %v1884_v40 = vld [vmem:[%s2938_s9 + $0x100] sm:$0xff] }
 0x1e3   : > { %v969_v55 = vpop.f32.mrf.mxu1  ;;  %1180 = vmatpush.msra.mxu0 %v1153_v30  ;;  %1264 = vmatpush.msrb.mxu2 %v1884_v40  ;;  %v1951_v30 = vld [vmem:[%s2943_s14 + $0xb8] sm:$0xff] }
 0x1e4   : > { %v1008_v48 = vrot.slane %v1004_v43, 7 }
 0x1e5   : > { %1181 = vmatpush.msra.mxu0 %v1152_v34 }
 0x1e6   : > { %v1013_v52 = vsel %vm662_vm0, 0.0, %v1008_v48 }
 0x1e7   : > { %1856 = vmatmul.msk.f32.vlgmr.msra.gmra.mxu2 %vm1039_vm4, %v1013_v52  ;;  %v1034_v63 = vrot.slane %v1013_v52, 1  ;;  %v1103_v0 = vrot.slane %v1013_v52, 2  ;;  %1182 = vmatpush.msra.mxu0 %v1151_v38 }
 0x1e8   : > { %1450 = vmatpush.msra.mxu2 %v1926_v15 }
 0x1e9   : > { %v1001_v59 = vpop.f32.mrf.mxu2 }
 0x1ea   : > { %v1005_v60 = vmax.f32 %v969_v55, %v1001_v59  ;;  %1451 = vmatpush.msra.mxu2 %v1925_v18  ;;  %v1676_v18 = vld [vmem:[%s2946_s17 + $0x8] sm:$0xff] }
 0x1ec   : > { %v1009_v61 = vrot.slane %v1005_v60, 7  ;;  %1452 = vmatpush.msra.mxu2 %v1924_v21 }
 0x1ee   : > { %v1010_v62 = vsel %vm662_vm0, %v1008_v48, %v1009_v61  ;;  %v1014_v5 = vsel %vm662_vm0, %v1009_v61, 0.0  ;;  %v2010_v48 = vld [vmem:[%s2937_s8] ss:$0 sm:$0xff]  ;;  %1453 = vmatpush.msra.mxu2 %v1923_v24 }
 0x1ef   : > { %v1035_v1 = vrot.slane %v1010_v62, 1  ;;  %v1104_v2 = vrot.slane %v1010_v62, 2  ;;  %1857 = vmatmul.msk.f32.gmra.mxu2 %vm1039_vm4, %v1010_v62  ;;  %v1037_v6 = vrot.slane %v1014_v5, 1  ;;  %v1106_v7 = vrot.slane %v1014_v5, 2 }
 0x1f1   : > { %v1036_v3 = vsel %vm685_vm3, %v1034_v63, %v1035_v1  ;;  %v1105_v4 = vsel %vm775_vm2, %v1103_v0, %v1104_v2  ;;  %v1038_v8 = vsel %vm685_vm3, %v1035_v1, %v1037_v6  ;;  %v1107_v9 = vsel %vm775_vm2, %v1104_v2, %v1106_v7 }
 0x1f2   : > { %1854 = vmatmul.msk.f32.vlgmr.msra.gmra.mxu1 %vm1039_vm4, %v1036_v3  ;;  %1866 = vmatmul.msk.f32.vlgmr.msrb.gmra.mxu3 %vm1039_vm4, %v1105_v4 }
 0x1f3   : > { %1539 = vmatpush.msrb.mxu3 %v1527_v26 }
 0x1f5   : > { %1540 = vmatpush.msrb.mxu3 %v1526_v28 }
 0x1fa   : > { %1855 = vmatmul.msk.f32.gmra.mxu1 %vm1039_vm4, %v1038_v8  ;;  %1867 = vmatmul.msk.f32.gmra.mxu3 %vm1039_vm4, %v1107_v9 }
 0x26a   : > { %v1088_v43 = vpop.f32.mrf.mxu2 }
 0x26f   : > { %v1061_v42 = vpop.f32.mrf.mxu1 }
 0x270   : > { %v1089_v44 = vadd.f32 %v1088_v43, %v1061_v42 }
 0x272   : > { %v1091_v52 = vpop.f32.mrf.mxu2 }
 0x275   : > { %v1129_v46 = vpop.f32.mrf.mxu3 }
 0x276   : > { %v1135_v47 = vadd.f32 %v1129_v46, %v1089_v44  ;;  %v1950_v44 = vld [vmem:[%s2943_s14 + $0xb0] sm:$0xff]  ;;  %v1525_v46 = vld [vmem:[%s2943_s14 + $0x28] sm:$0xff] }
 0x277   : > { %v1064_v50 = vpop.f32.mrf.mxu1  ;;  %1541 = vmatpush.msrb.mxu3 %v1525_v46 }
 0x278   : > { %v1141_v49 = vmul.f32 %v2009_v45, %v1135_v47  ;;  %v1092_v54 = vadd.f32 %v1091_v52, %v1064_v50  ;;  %v1940_v47 = vld [vmem:[%s2943_s14 + $0x68] sm:$0xff]  ;;  %v1524_v50 = vld [vmem:[%s2943_s14 + $0x20] sm:$0xff] }
 0x279   : > { %v1948_v52 = vld [vmem:[%s2943_s14 + $0xa0] sm:$0xff]  ;;  %1542 = vmatpush.msrb.mxu3 %v1524_v50 }
 0x27a   : > { %v1147_v51 = vadd.f32 %v2010_v48, %v1141_v49  ;;  %v1958_v49 = vld [vmem:[%s2943_s14 + $0xe8] sm:$0xff] }
 0x27c   : > { %v1149_v53 = vmax.f32 %v1147_v51, 0.0  ;;  %v1939_v51 = vld [vmem:[%s2943_s14 + $0x60] sm:$0xff] }
 0x27d   : > { %v1132_v55 = vpop.f32.mrf.mxu3 }
 0x27e   : > { %v1136_v56 = vadd.f32 %v1132_v55, %v1092_v54  ;;  %1183 = vmatmul.f32.vlgmr.msra.gmra.mxu0 %v1149_v53  ;;  %1223 = vmatmul.f32.vlgmr.msrb.gmra.mxu1 %v1149_v53  ;;  %v1523_v54 = vld [vmem:[%s2943_s14 + $0x18] sm:$0xff] }
 0x27f   : > { %1265 = vmatmul.f32.vlgmr.msrb.gmra.mxu2 %v1149_v53  ;;  %1307 = vmatmul.f32.vlgmr.msra.gmra.mxu3 %v1149_v53  ;;  %v1957_v53 = vld [vmem:[%s2943_s14 + $0xe0] sm:$0xff]  ;;  %v1938_v55 = vld [vmem:[%s2943_s14 + $0x58] sm:$0xff] }
 0x280   : > { %v1142_v57 = vmul.f32 %v2009_v45, %v1136_v56  ;;  %1568 = vmatpush.msrb.mxu2 %v1942_v27  ;;  %v1959_v45 = vld [vmem:[%s2943_s14 + $0xf0] sm:$0xff]  ;;  %v1947_v56 = vld [vmem:[%s2943_s14 + $0x98] sm:$0xff]  ;;  %1543 = vmatpush.msrb.mxu3 %v1523_v54 }
 0x282   : > { %v1148_v58 = vadd.f32 %v2010_v48, %v1142_v57  ;;  %1569 = vmatpush.msrb.mxu2 %v1941_v29  ;;  %v1949_v48 = vld [vmem:[%s2943_s14 + $0xa8] sm:$0xff]  ;;  %v1956_v57 = vld [vmem:[%s2943_s14 + $0xd8] sm:$0xff] }
 0x284   : > { %v1150_v59 = vmax.f32 %v1148_v58, 0.0  ;;  %1570 = vmatpush.msrb.mxu2 %v1940_v47  ;;  %v1522_v58 = vld [vmem:[%s2943_s14 + $0x10] sm:$0xff] }
 0x285   : > { %1544 = vmatpush.msrb.mxu3 %v1522_v58 }
 0x286   : > { %1186 = vmatmul.f32.gmra.mxu0 %v1150_v59  ;;  %1226 = vmatmul.f32.gmra.mxu1 %v1150_v59 }
 0x287   : > { %1268 = vmatmul.f32.gmra.mxu2 %v1150_v59  ;;  %1310 = vmatmul.f32.gmra.mxu3 %v1150_v59  ;;  %v1937_v59 = vld [vmem:[%s2943_s14 + $0x50] sm:$0xff] }
 0x288   : > { %1571 = vmatpush.msrb.mxu2 %v1939_v51 }
 0x28a   : > { %1572 = vmatpush.msrb.mxu2 %v1938_v55 }
 0x28c   : > { %1573 = vmatpush.msrb.mxu2 %v1937_v59 }
 0x2fb   : > { %v1184_v60 = vpop.f32.mrf.mxu0  ;;  %v1224_v61 = vpop.f32.mrf.mxu1 }
 0x2fc   : > { %v1230_v2 = vmax.f32 %v1184_v60, %v1224_v61  ;;  %v1946_v60 = vld [vmem:[%s2943_s14 + $0x90] sm:$0xff] }
 0x2fd   : > { %v1955_v61 = vld [vmem:[%s2943_s14 + $0xd0] sm:$0xff] }
 0x302   : > { %v1266_v62 = vpop.f32.mrf.mxu2  ;;  %v1308_v63 = vpop.f32.mrf.mxu3 }
 0x303   : > { %v1187_v0 = vpop.f32.mrf.mxu0  ;;  %v1227_v1 = vpop.f32.mrf.mxu1  ;;  %v1272_v5 = vmax.f32 %v1230_v2, %v1266_v62  ;;  %v1521_v62 = vld [vmem:[%s2943_s14 + $0x8] sm:$0xff]  ;;  %v1935_v2 = vld [vmem:[%s2943_s14 + $0x40] sm:$0xff] }
 0x304   : > { %v1231_v3 = vmax.f32 %v1187_v0, %v1227_v1  ;;  %v1945_v0 = vld [vmem:[%s2943_s14 + $0x88] sm:$0xff]  ;;  %1545 = vmatpush.msrb.mxu3 %v1521_v62  ;;  %v1520_v1 = vld [vmem:[%s2943_s14] sm:$0xff] }
 0x305   : > { %v1314_v9 = vmax.f32 %v1272_v5, %v1308_v63  ;;  %v1936_v63 = vld [vmem:[%s2943_s14 + $0x48] sm:$0xff]  ;;  %v1953_v5 = vld [vmem:[%s2943_s14 + $0xc0] sm:$0xff] }
 0x306   : > { %1574 = vmatpush.msrb.mxu2 %v1936_v63  ;;  %1546 = vmatpush.msrb.mxu3 %v1520_v1 }
 0x308   : > { %1575 = vmatpush.msrb.mxu2 %v1935_v2 }
 0x30a   : > { %v1269_v4 = vpop.f32.mrf.mxu2  ;;  %v1311_v7 = vpop.f32.mrf.mxu3 }
 0x30b   : > { %v1273_v6 = vmax.f32 %v1231_v3, %v1269_v4  ;;  %v1954_v3 = vld [vmem:[%s2943_s14 + $0xc8] sm:$0xff]  ;;  %v1944_v4 = vld [vmem:[%s2943_s14 + $0x80] sm:$0xff] }
 0x30d   : > { %v1315_v8 = vmax.f32 %v1273_v6, %v1311_v7 }
 0x30f   : > { %1335 = vmatpush.msrb.mxu0 %v1315_v8  ;;  %1412 = vmatpush.msra.mxu1 %v1315_v8 }
 0x311   : > { %1336 = vmatpush.msrb.mxu0 %v1314_v9  ;;  %1413 = vmatpush.msra.mxu1 %v1314_v9 }
 0x312   : > { %1916 = vmatmul.msk.f32.vlgmr.msrb.gmra.mxu0 %vm1317_vm5, %v1316_v10  ;;  %1922 = vmatmul.msk.f32.vlgmr.msra.gmra.mxu1 %vm1317_vm5, %v1921_v11 }
 0x313   : > { %1360 = vmatpush.msra.mxu0 %v1315_v8  ;;  %1500 = vmatpush.msrb.mxu1 %v1932_v17  ;;  %v1650_v17 = vld [vmem:[%s2945_s16] sm:$0xff] }
 0x315   : > { %1361 = vmatpush.msra.mxu0 %v1314_v9  ;;  %1501 = vmatpush.msrb.mxu1 %v1931_v20 }
 0x317   : > { %1386 = vmatpush.msrb.mxu0 %v1315_v8  ;;  %1502 = vmatpush.msrb.mxu1 %v1930_v23 }
 0x319   : > { %1387 = vmatpush.msrb.mxu0 %v1314_v9  ;;  %1503 = vmatpush.msrb.mxu1 %v1929_v25  ;;  %v2011_v9 = vld [vmem:[%s2941_s12] ss:$0 sm:$0xff] }
 0x31a   : > { %1918 = vmatmul.msk.f32.vlgmr.msra.gmra.mxu0 %vm1317_vm5, %v1917_v12  ;;  %v2012_v12 = vld [vmem:[%s2942_s13] ss:$0 sm:$0xff] }
 0x31b   : > { %1472 = vmatpush.msra.mxu0 %v1428_v14  ;;  %1628 = vmatpush.msra.mxu1 %v1960_v31 }
 0x31d   : > { %1473 = vmatpush.msra.mxu0 %v1427_v16  ;;  %1629 = vmatpush.msra.mxu1 %v1959_v45  ;;  %v1651_v16 = vld [vmem:[%s2945_s16 + $0x8] sm:$0xff] }
 0x31e   : > { %1669 = vmatpush.msra.mxu3 %v1651_v16 }
 0x31f   : > { %1474 = vmatpush.msra.mxu0 %v1426_v19  ;;  %1630 = vmatpush.msra.mxu1 %v1958_v49 }
 0x320   : > { %1670 = vmatpush.msra.mxu3 %v1650_v17 }
 0x321   : > { %1475 = vmatpush.msra.mxu0 %v1425_v22  ;;  %1631 = vmatpush.msra.mxu1 %v1957_v53 }
 0x322   : > { %1920 = vmatmul.msk.f32.vlgmr.msrb.gmra.mxu0 %vm1317_vm5, %v1919_v13 }
 0x323   : > { %1598 = vmatpush.msrb.mxu0 %v1951_v30  ;;  %1632 = vmatpush.msra.mxu1 %v1956_v57 }
 0x325   : > { %1599 = vmatpush.msrb.mxu0 %v1950_v44  ;;  %1633 = vmatpush.msra.mxu1 %v1955_v61 }
 0x327   : > { %1600 = vmatpush.msrb.mxu0 %v1949_v48  ;;  %1634 = vmatpush.msra.mxu1 %v1954_v3 }
 0x329   : > { %1601 = vmatpush.msrb.mxu0 %v1948_v52  ;;  %1635 = vmatpush.msra.mxu1 %v1953_v5 }
 0x32b   : > { %1602 = vmatpush.msrb.mxu0 %v1947_v56 }
 0x32d   : > { %1603 = vmatpush.msrb.mxu0 %v1946_v60 }
 0x32f   : > { %1604 = vmatpush.msrb.mxu0 %v1945_v0 }
 0x331   : > { %1605 = vmatpush.msrb.mxu0 %v1944_v4 }
 0x38f   : > { %v1338_v32 = vpop.f32.mrf.mxu0  ;;  %v1415_v36 = vpop.f32.mrf.mxu1 }
 0x397   : > { %v1363_v33 = vpop.f32.mrf.mxu0 }
 0x398   : > { %v1366_v34 = vmax.f32 %v1338_v32, %v1363_v33  ;;  %v1675_v33 = vld [vmem:[%s2946_s17] sm:$0xff] }
 0x39f   : > { %v1389_v35 = vpop.f32.mrf.mxu0 }
 0x3a0   : > { %v1392_v37 = vmax.f32 %v1366_v34, %v1389_v35  ;;  %v1703_v35 = vld [vmem:[%s2948_s19 + $0x8] sm:$0xff] }
 0x3a2   : > { %v1418_v38 = vmax.f32 %v1392_v37, %v1415_v36  ;;  %v1702_v36 = vld [vmem:[%s2948_s19] sm:$0xff] }
 0x3a3   : > { %v1677_v37 = vld [vmem:[%s2947_s18] sm:$0x1] }
 0x3a4   : > { %v1420_v39 = vrot.slane %v1418_v38, 7 }
 0x3a6   : > { %v1422_v40 = vsel %vm662_vm0, 0.0, %v1420_v39 }
 0x3a7   : > { %v1424_v41 = vsel %vm1423_vm6, %v1422_v40, 0.0 }
 0x3a8   : > { %v1435_v42 = vrot.slane %v1424_v41, 1  ;;  %v1485_v43 = vrot.slane %v1424_v41, 2  ;;  %1928 = vmatmul.msk.f32.vlgmr.msra.gmra.mxu0 %vm695_vm1, %v1424_v41  ;;  %v1704_v41 = vld [vmem:[%s2949_s20] sm:$0x1] }
 0x3aa   : > { %1927 = vmatmul.msk.f32.vlgmr.msra.gmra.mxu2 %vm695_vm1, %v1435_v42  ;;  %1933 = vmatmul.msk.f32.vlgmr.msrb.gmra.mxu1 %vm695_vm1, %v1485_v43 }
 0x3ab   : > { %1695 = vmatpush.msra.mxu2 %v1676_v18 }
 0x3ad   : > { %1696 = vmatpush.msra.mxu2 %v1675_v33 }
 0x425   : > { %v1477_v7 = vpop.f32.mrf.mxu0 }
 0x427   : > { %v1505_v10 = vpop.f32.mrf.mxu1 }
 0x42d   : > { %v1455_v6 = vpop.f32.mrf.mxu2 }
 0x42e   : > { %v1478_v8 = vadd.f32 %v1477_v7, %v1455_v6 }
 0x430   : > { %v1508_v11 = vadd.f32 %v1505_v10, %v1478_v8 }
 0x432   : > { %v1513_v13 = vmul.f32 %v2011_v9, %v1508_v11 }
 0x434   : > { %v1518_v14 = vadd.f32 %v2012_v12, %v1513_v13 }
 0x436   : > { %v1519_v15 = vmax.f32 %v1518_v14, 0.0 }
 0x438   : > { %1934 = vmatmul.msk.f32.vlgmr.msrb.gmra.mxu3 %vm1039_vm4, %v1519_v15  ;;  %1943 = vmatmul.msk.f32.vlgmr.msrb.gmra.mxu2 %vm1039_vm4, %v1519_v15 }
 0x439   : > { %1952 = vmatmul.msk.f32.vlgmr.msrb.gmra.mxu0 %vm1039_vm4, %v1519_v15  ;;  %1961 = vmatmul.msk.f32.vlgmr.msra.gmra.mxu1 %vm1039_vm4, %v1519_v15 }
 0x43a   : > { %1722 = vmatpush.msrb.mxu3 %v1703_v35 }
 0x43c   : > { %1723 = vmatpush.msrb.mxu3 %v1702_v36 }
 0x4b6   : > { %v1607_v22 = vpop.f32.mrf.mxu0  ;;  %v1637_v24 = vpop.f32.mrf.mxu1 }
 0x4bb   : > { %v1548_v19 = vpop.f32.mrf.mxu3  ;;  %v1577_v20 = vpop.f32.mrf.mxu2 }
 0x4bc   : > { %v1580_v21 = vmax.f32 %v1548_v19, %v1577_v20 }
 0x4be   : > { %v1610_v23 = vmax.f32 %v1580_v21, %v1607_v22 }
 0x4c0   : > { %v1640_v25 = vmax.f32 %v1610_v23, %v1637_v24 }
 0x4c2   : > { %v1642_v26 = vsel %vm1641_vm7, %v1640_v25, -inf }
 0x4c3   : > { %v1643_v27 = vrot.slane %v1642_v26, 4 }
 0x4c5   : > { %v1644_v28 = vmax.f32 %v1642_v26, %v1643_v27 }
 0x4c7   : > { %v1645_v29 = vrot.slane %v1644_v28, 2 }
 0x4c9   : > { %v1646_v30 = vmax.f32 %v1644_v28, %v1645_v29 }
 0x4cb   : > { %v1647_v31 = vrot.slane %v1646_v30, 1 }
 0x4cd   : > { %v1648_v32 = vmax.f32 %v1646_v30, %v1647_v31 }
 0x4cf   : > { %1962 = vmatmul.msk.f32.vlgmr.msra.gmra.mxu3 %vm1317_vm5, %v1648_v32 }
 0x552   : > { %v1672_v34 = vpop.f32.mrf.mxu3 }
 0x553   : > { %1963 = vmatmul.msk.f32.vlgmr.msra.gmra.mxu2 %vm1317_vm5, %v1672_v34 }
 0x5d6   : > { %v1698_v38 = vpop.f32.mrf.mxu2 }
 0x5d7   : > { %v1699_v39 = vadd.f32 %v1698_v38, %v1677_v37 }
 0x5d9   : > { %v1701_v40 = vmax.f32 %v1699_v39, 0.0 }
 0x5db   : > { %1964 = vmatmul.msk.f32.vlgmr.msrb.gmra.mxu3 %vm1317_vm5, %v1701_v40 }
 0x65e   : > { %v1725_v42 = vpop.f32.mrf.mxu3 }
 0x65f   : > { %v1726_v43 = vadd.f32 %v1725_v42, %v1704_v41 }
 0x661   : > { %1729 = vst.msk [vmem:[%s648_s4] sm:$0x1] %vm1728_vm8, %v1726_v43 }
 0x662   : > { %2040 = shalt.err (!%p2037_p3)
}
 0x663   : > { %1968 = dma.vmem_to_hbm [thread:$0]  (%p2225_p5), %s1742_s5, 16, %s1744_s1, %s1731_s29  }
 0x664 PF: > { %s2989_s23 = sld [smem:[#allocation7_spill]] }
 0x665   : > { %s2990_s25 = sld [smem:[#allocation5_spill]] }
 0x66a   : > { %p1974_p4 = scmp.ge.s32.totalorder %s2989_s23, 2 }
 0x66b   : > { %s1755_s7 = sand.u32 1, %s2990_s25  }
 0x66c   : > { %p1971_p7 = pnand %p1974_p4, %p2229_p6  ;;  %s1756_s27 = scalar_lea.sflag [#allocation3], %s1755_s7 }
 0x66e   : > { %p1972_p8 = pneg %p1971_p7 }
 0x670   : > { %2058 = dma.done.wait (%p1972_p8), %s1756_s27, 16  }
 0x671   : > { %2060 = vsyncadd (%p1972_p8), %s1756_s27, 4294967280  ;;  %s2992_s26 = sld [smem:[#allocation8_spill]]  ;;  %s2995_s15 = smov %s2067_s2 }
 0x672   : > { %s2993_s6 = sld [smem:[#allocation6_spill]] }
 0x673   : > { %s2994_s25 = sld [smem:[#allocation9_spill]] }
 0x677   : > { %p31_p9 = scmp.ge.s32.totalorder %s2992_s26, 4  }
 0x678   : > { %s2996_s2 = smov %s2993_s6 }
 0x679   :  { %33 = sbr.rel (!%p31_p9) target bundleno = 12 (0xc), region = 156 }
 0x67e   :  { %1761 = vsyncpa [#allocation3], 1 }
 0x67f   :  { %1763 = vsyncpa [#allocation3 + $0x1], 1 }

</bundles_post_ra>
